<compile_context>
chip_gen: v7x
topology: tpu7x:2x2x1
jax: 0.10.0
libtpu: 0.0.40
codegen_flags: <defaults>
</compile_context>

<pallas_src>
import math

import jax
import jax.numpy as jnp
from jax import lax
from jax.experimental import pallas as pl
from jax.experimental.pallas import tpu as pltpu

_INV_SQRT2 = 1.0 / math.sqrt(2.0)


# ---------------------------------------------------------------------------
# Pass 1: sequence-parallel precompute (left branch + fused GRU input terms)
# ---------------------------------------------------------------------------
def _precompute_kernel(x_ref, wl_ref, bl_ref,
                       wcr_ref, wcz_ref, wcn_ref,
                       bcr_ref, bcz_ref, bcn_ref,
                       l_ref, ar_ref, az_ref, an_ref):
    x = x_ref[...]                                    # (R, F)

    # left branch: Linear -> exact (erf-based) GELU, like nn.GELU()
    l = jnp.dot(x, wl_ref[...], preferred_element_type=jnp.float32) + bl_ref[...]
    l = 0.5 * l * (1.0 + lax.erf(l * jnp.float32(_INV_SQRT2)))
    l_ref[...] = l.astype(l_ref.dtype)

    # fused right-branch input terms, one per GRU gate (r, z, n)
    ar_ref[...] = (jnp.dot(x, wcr_ref[...], preferred_element_type=jnp.float32)
                   + bcr_ref[...]).astype(ar_ref.dtype)
    az_ref[...] = (jnp.dot(x, wcz_ref[...], preferred_element_type=jnp.float32)
                   + bcz_ref[...]).astype(az_ref.dtype)
    an_ref[...] = (jnp.dot(x, wcn_ref[...], preferred_element_type=jnp.float32)
                   + bcn_ref[...]).astype(an_ref.dtype)


# ---------------------------------------------------------------------------
# Pass 2: sequential GRU recurrence + gating (only h-dependent work remains)
# ---------------------------------------------------------------------------
def _recurrent_kernel(l_ref, ar_ref, az_ref, an_ref,
                      whr_ref, whz_ref, whn_ref, bhn_ref,
                      out_ref, h_ref):
    s = pl.program_id(1)                              # inner, sequential axis

    @pl.when(s == 0)
    def _():
        h_ref[...] = jnp.zeros_like(h_ref)            # GRU h_0 = 0 per batch block

    whr = whr_ref[...]
    whz = whz_ref[...]
    whn = whn_ref[...]
    bhn = bhn_ref[...]
    T = l_ref.shape[0]

    def step(t, h):
        gh_r = jnp.dot(h, whr, preferred_element_type=jnp.float32)
        gh_z = jnp.dot(h, whz, preferred_element_type=jnp.float32)
        gh_n = jnp.dot(h, whn, preferred_element_type=jnp.float32) + bhn
        r = jax.nn.sigmoid(ar_ref[t] + gh_r)          # input-side terms precomputed
        z = jax.nn.sigmoid(az_ref[t] + gh_z)
        n = jnp.tanh(an_ref[t] + r * gh_n)            # n-gate hidden bias inside r*(.)
        h_new = (1.0 - z) * n + z * h
        out_ref[t] = (l_ref[t] * h_new).astype(out_ref.dtype)   # dropout = identity
        return h_new

    h_last = lax.fori_loop(0, T, step, h_ref[...],
                           unroll=True if T <= 16 else 8)
    h_ref[...] = h_last                               # carry hidden state forward


def _largest_divisor_leq(n, cap):
    for t in range(min(n, cap), 0, -1):
        if n % t == 0:
            return t
    return 1


def graffin_forward(x, params, *, seq_block_cap=16):
    """x: (S, B, F) float32. Returns (S, B, H)."""
    S, B, F = x.shape
    wl, bl, wr, br, wih, bih, whh, bhh = params
    H = wl.shape[1]
    f32 = jnp.float32

    # ---- offline algebraic fusion & bias folding (runs once, outside kernels) ----
    w_comb = wr @ wih                                 # (F, 3H): gi = x @ (Wr@Wih) + ...
    b_comb = br @ wih + bih                           # (1, 3H)
    wc_r, wc_z, wc_n = w_comb[:, :H], w_comb[:, H:2 * H], w_comb[:, 2 * H:]
    bc_r = b_comb[:, :H] + bhh[:, :H]                 # fold r-gate hidden bias (exact)
    bc_z = b_comb[:, H:2 * H] + bhh[:, H:2 * H]       # fold z-gate hidden bias (exact)
    bc_n = b_comb[:, 2 * H:]                          # n-gate hidden bias must stay in kernel
    wh_r, wh_z, wh_n = whh[:, :H], whh[:, H:2 * H], whh[:, 2 * H:]
    bh_n = bhh[:, 2 * H:]

    # ---------------- pass 1: one big (S*B, F) batched matmul ----------------
    rows = S * B
    R = min(rows, 1024)                               # row block (lane-/sublane-friendly)
    x2 = x.reshape(rows, F).astype(f32)
    wfull1 = lambda i: (0, 0)

    l2, ar2, az2, an2 = pl.pallas_call(
        _precompute_kernel,
        out_shape=tuple(jax.ShapeDtypeStruct((rows, H), f32) for _ in range(4)),
        grid_spec=pltpu.PrefetchScalarGridSpec(
            num_scalar_prefetch=0,
            grid=(pl.cdiv(rows, R),),
            in_specs=[
                pl.BlockSpec((R, F), lambda i: (i, 0)),   # x rows
                pl.BlockSpec((F, H), wfull1),             # Wl^T
                pl.BlockSpec((1, H), wfull1),             # bl
                pl.BlockSpec((F, H), wfull1),             # W_comb (r)
                pl.BlockSpec((F, H), wfull1),             # W_comb (z)
                pl.BlockSpec((F, H), wfull1),             # W_comb (n)
                pl.BlockSpec((1, H), wfull1),             # folded bias (r)
                pl.BlockSpec((1, H), wfull1),             # folded bias (z)
                pl.BlockSpec((1, H), wfull1),             # folded bias (n)
            ],
            out_specs=tuple(pl.BlockSpec((R, H), lambda i: (i, 0)) for _ in range(4)),
        ),
        compiler_params=pltpu.CompilerParams(
            dimension_semantics=("parallel",),
            vmem_limit_bytes=48 * 1024 * 1024),
    )(x2, wl, bl, wc_r, wc_z, wc_n, bc_r, bc_z, bc_n)

    l3 = l2.reshape(S, B, H)
    ar3 = ar2.reshape(S, B, H)
    az3 = az2.reshape(S, B, H)
    an3 = an2.reshape(S, B, H)

    # ---------------- pass 2: sequential recurrence over S -------------------
    T = _largest_divisor_leq(S, seq_block_cap)        # timesteps per grid iteration
    # batch split (megacore) only when it stays (8,128)-tile friendly
    Bb = B // 2 if (B >= 16 and B % 16 == 0) else B
    nb, ns = B // Bb, S // T

    seq_spec = pl.BlockSpec((T, Bb, H), lambda b, s: (s, b, 0))
    wfull2 = lambda b, s: (0, 0)

    out = pl.pallas_call(
        _recurrent_kernel,
        out_shape=jax.ShapeDtypeStruct((S, B, H), f32),
        grid_spec=pltpu.PrefetchScalarGridSpec(
            num_scalar_prefetch=0,
            grid=(nb, ns),
            in_specs=[
                seq_spec, seq_spec, seq_spec, seq_spec,     # l, a_r, a_z, a_n
                pl.BlockSpec((H, H), wfull2),               # Whh (r)
                pl.BlockSpec((H, H), wfull2),               # Whh (z)
                pl.BlockSpec((H, H), wfull2),               # Whh (n)
                pl.BlockSpec((1, H), wfull2),               # bhh (n)
            ],
            out_specs=seq_spec,
            scratch_shapes=[pltpu.VMEM((Bb, H), f32)],      # persistent GRU hidden state
        ),
        compiler_params=pltpu.CompilerParams(
            dimension_semantics=("parallel", "arbitrary"),  # batch parallel, seq sequential
            vmem_limit_bytes=48 * 1024 * 1024),
    )(l3, ar3, az3, an3, wh_r, wh_z, wh_n, bh_n)

    return out


def graffin_reference(x, params):
    """Pure-JAX reference (mirrors the PyTorch forward, eval mode, unfused)."""
    wl, bl, wr, br, wih, bih, whh, bhh = params
    H = wl.shape[1]

    l = x @ wl + bl[0]
    l = 0.5 * l * (1.0 + lax.erf(l / jnp.sqrt(2.0)))
    xr = x @ wr + br[0]

    def step(h, xr_t):
        gi = xr_t @ wih + bih[0]
        gh = h @ whh + bhh[0]
        r = jax.nn.sigmoid(gi[:, :H] + gh[:, :H])
        z = jax.nn.sigmoid(gi[:, H:2 * H] + gh[:, H:2 * H])
        n = jnp.tanh(gi[:, 2 * H:] + r * gh[:, 2 * H:])
        h_new = (1.0 - z) * n + z * h
        return h_new, h_new

    h0 = jnp.zeros((x.shape[1], H), jnp.float32)
    _, rseq = lax.scan(step, h0, xr)
    return l * rseq


def init_params(key, feature_size, hidden_size):
    """Deterministic init, same shapes as the PyTorch module (weights pre-transposed)."""
    ks = jax.random.split(key, 8)

    def u(k, shape, fan_in):
        bound = 1.0 / math.sqrt(fan_in)
        return jax.random.uniform(k, shape, jnp.float32, -bound, bound)

    F, H = feature_size, hidden_size
    wl = u(ks[0], (F, H), F)          # llin.weight^T
    bl = u(ks[1], (1, H), F)          # llin.bias
    wr = u(ks[2], (F, H), F)          # rlin.weight^T
    br = u(ks[3], (1, H), F)          # rlin.bias
    wih = u(ks[4], (H, 3 * H), H)     # rgru.weight_ih_l0^T  (gates ordered r,z,n)
    bih = u(ks[5], (1, 3 * H), H)     # rgru.bias_ih_l0
    whh = u(ks[6], (H, 3 * H), H)     # rgru.weight_hh_l0^T
    bhh = u(ks[7], (1, 3 * H), H)     # rgru.bias_hh_l0
    return (wl, bl, wr, br, wih, bih, whh, bhh)


if __name__ == "__main__":
    S, B, F, H = 8, 2, 16, 32

    key = jax.random.PRNGKey(0)
    kx, kp = jax.random.split(key)
    x = jax.random.normal(kx, (S, B, F), jnp.float32)
    params = init_params(kp, F, H)

    fwd = jax.jit(graffin_forward)
    out = fwd(x, params)
    out = jax.block_until_ready(out)

    ref = graffin_reference(x, params)
    assert out.shape == (S, B, H)
    # (slightly loosened tolerance: wr@wih algebraic fusion changes f32 rounding)
    assert jnp.allclose(out, ref, atol=1e-4, rtol=1e-4), \
        f"max abs err {jnp.max(jnp.abs(out - ref))}"

    print("KERNEL_OK")
</pallas_src>

<mosaic_0001>
module attributes {stable_mosaic.version = 11 : i64} {
  func.func @_precompute_kernel(%arg0: i32, %arg1: memref<16x16xf32, #tpu.memory_space<vmem>>, %arg2: memref<16x32xf32, #tpu.memory_space<vmem>>, %arg3: memref<1x32xf32, #tpu.memory_space<vmem>>, %arg4: memref<16x32xf32, #tpu.memory_space<vmem>>, %arg5: memref<16x32xf32, #tpu.memory_space<vmem>>, %arg6: memref<16x32xf32, #tpu.memory_space<vmem>>, %arg7: memref<1x32xf32, #tpu.memory_space<vmem>>, %arg8: memref<1x32xf32, #tpu.memory_space<vmem>>, %arg9: memref<1x32xf32, #tpu.memory_space<vmem>>, %arg10: memref<16x32xf32, #tpu.memory_space<vmem>>, %arg11: memref<16x32xf32, #tpu.memory_space<vmem>>, %arg12: memref<16x32xf32, #tpu.memory_space<vmem>>, %arg13: memref<16x32xf32, #tpu.memory_space<vmem>>) attributes {dimension_semantics = [#tpu.dimension_semantics<parallel>], iteration_bounds = array<i64: 1>, scalar_prefetch = 0 : i64, scratch_operands = 0 : i64, tpu.core_type = #tpu.core_type<tc>, window_params = [{transform_indices = @transform_0, window_bounds = array<i64: 16, 16>}, {pipeline_mode = #tpu.pipeline_mode<synchronous>, transform_indices = @transform_1, window_bounds = array<i64: 16, 32>}, {pipeline_mode = #tpu.pipeline_mode<synchronous>, transform_indices = @transform_2, window_bounds = array<i64: 1, 32>}, {pipeline_mode = #tpu.pipeline_mode<synchronous>, transform_indices = @transform_3, window_bounds = array<i64: 16, 32>}, {pipeline_mode = #tpu.pipeline_mode<synchronous>, transform_indices = @transform_4, window_bounds = array<i64: 16, 32>}, {pipeline_mode = #tpu.pipeline_mode<synchronous>, transform_indices = @transform_5, window_bounds = array<i64: 16, 32>}, {pipeline_mode = #tpu.pipeline_mode<synchronous>, transform_indices = @transform_6, window_bounds = array<i64: 1, 32>}, {pipeline_mode = #tpu.pipeline_mode<synchronous>, transform_indices = @transform_7, window_bounds = array<i64: 1, 32>}, {pipeline_mode = #tpu.pipeline_mode<synchronous>, transform_indices = @transform_8, window_bounds = array<i64: 1, 32>}, {transform_indices = @transform_9, window_bounds = array<i64: 16, 32>}, {transform_indices = @transform_10, window_bounds = array<i64: 16, 32>}, {transform_indices = @transform_11, window_bounds = array<i64: 16, 32>}, {transform_indices = @transform_12, window_bounds = array<i64: 16, 32>}]} {
    %c0 = arith.constant 0 : index
    %c0_0 = arith.constant 0 : index
    %0 = vector.load %arg1[%c0, %c0_0] : memref<16x16xf32, #tpu.memory_space<vmem>>, vector<16x16xf32>
    %c0_1 = arith.constant 0 : index
    %c0_2 = arith.constant 0 : index
    %1 = vector.load %arg2[%c0_1, %c0_2] : memref<16x32xf32, #tpu.memory_space<vmem>>, vector<16x32xf32>
    %cst = arith.constant dense<0.000000e+00> : vector<16x32xf32>
    %2 = tpu.matmul %0, %1, %cst {dimension_numbers = #tpu.dot_dimension_numbers<[1], [0], [0], [1], [0, 0, 1, 1], [], []>} : vector<16x16xf32>, vector<16x32xf32>, vector<16x32xf32> -> vector<16x32xf32>
    %c0_3 = arith.constant 0 : index
    %c0_4 = arith.constant 0 : index
    %3 = vector.load %arg3[%c0_3, %c0_4] : memref<1x32xf32, #tpu.memory_space<vmem>>, vector<1x32xf32>
    %4 = vector.broadcast %3 : vector<1x32xf32> to vector<16x32xf32>
    %5 = arith.addf %2, %4 : vector<16x32xf32>
    %cst_5 = arith.constant 5.000000e-01 : f32
    %6 = vector.broadcast %cst_5 : f32 to vector<16x32xf32>
    %7 = arith.mulf %6, %5 : vector<16x32xf32>
    %cst_6 = arith.constant 0.707106769 : f32
    %8 = vector.broadcast %cst_6 : f32 to vector<16x32xf32>
    %9 = arith.mulf %5, %8 : vector<16x32xf32>
    %10 = math.erf %9 : vector<16x32xf32>
    %cst_7 = arith.constant 1.000000e+00 : f32
    %11 = vector.broadcast %cst_7 : f32 to vector<16x32xf32>
    %12 = arith.addf %11, %10 : vector<16x32xf32>
    %13 = arith.mulf %7, %12 : vector<16x32xf32>
    %c0_8 = arith.constant 0 : index
    %c0_9 = arith.constant 0 : index
    %14 = vector.load %arg10[%c0_8, %c0_9] : memref<16x32xf32, #tpu.memory_space<vmem>>, vector<16x32xf32>
    tpu.vector_store %arg10[%c0_8, %c0_9], %13 {strides = array<i32>} : memref<16x32xf32, #tpu.memory_space<vmem>>, vector<16x32xf32>,
    %c0_10 = arith.constant 0 : index
    %c0_11 = arith.constant 0 : index
    %15 = vector.load %arg4[%c0_10, %c0_11] : memref<16x32xf32, #tpu.memory_space<vmem>>, vector<16x32xf32>
    %cst_12 = arith.constant dense<0.000000e+00> : vector<16x32xf32>
    %16 = tpu.matmul %0, %15, %cst_12 {dimension_numbers = #tpu.dot_dimension_numbers<[1], [0], [0], [1], [0, 0, 1, 1], [], []>} : vector<16x16xf32>, vector<16x32xf32>, vector<16x32xf32> -> vector<16x32xf32>
    %c0_13 = arith.constant 0 : index
    %c0_14 = arith.constant 0 : index
    %17 = vector.load %arg7[%c0_13, %c0_14] : memref<1x32xf32, #tpu.memory_space<vmem>>, vector<1x32xf32>
    %18 = vector.broadcast %17 : vector<1x32xf32> to vector<16x32xf32>
    %19 = arith.addf %16, %18 : vector<16x32xf32>
    %c0_15 = arith.constant 0 : index
    %c0_16 = arith.constant 0 : index
    %20 = vector.load %arg11[%c0_15, %c0_16] : memref<16x32xf32, #tpu.memory_space<vmem>>, vector<16x32xf32>
    tpu.vector_store %arg11[%c0_15, %c0_16], %19 {strides = array<i32>} : memref<16x32xf32, #tpu.memory_space<vmem>>, vector<16x32xf32>,
    %c0_17 = arith.constant 0 : index
    %c0_18 = arith.constant 0 : index
    %21 = vector.load %arg5[%c0_17, %c0_18] : memref<16x32xf32, #tpu.memory_space<vmem>>, vector<16x32xf32>
    %cst_19 = arith.constant dense<0.000000e+00> : vector<16x32xf32>
    %22 = tpu.matmul %0, %21, %cst_19 {dimension_numbers = #tpu.dot_dimension_numbers<[1], [0], [0], [1], [0, 0, 1, 1], [], []>} : vector<16x16xf32>, vector<16x32xf32>, vector<16x32xf32> -> vector<16x32xf32>
    %c0_20 = arith.constant 0 : index
    %c0_21 = arith.constant 0 : index
    %23 = vector.load %arg8[%c0_20, %c0_21] : memref<1x32xf32, #tpu.memory_space<vmem>>, vector<1x32xf32>
    %24 = vector.broadcast %23 : vector<1x32xf32> to vector<16x32xf32>
    %25 = arith.addf %22, %24 : vector<16x32xf32>
    %c0_22 = arith.constant 0 : index
    %c0_23 = arith.constant 0 : index
    %26 = vector.load %arg12[%c0_22, %c0_23] : memref<16x32xf32, #tpu.memory_space<vmem>>, vector<16x32xf32>
    tpu.vector_store %arg12[%c0_22, %c0_23], %25 {strides = array<i32>} : memref<16x32xf32, #tpu.memory_space<vmem>>, vector<16x32xf32>,
    %c0_24 = arith.constant 0 : index
    %c0_25 = arith.constant 0 : index
    %27 = vector.load %arg6[%c0_24, %c0_25] : memref<16x32xf32, #tpu.memory_space<vmem>>, vector<16x32xf32>
    %cst_26 = arith.constant dense<0.000000e+00> : vector<16x32xf32>
    %28 = tpu.matmul %0, %27, %cst_26 {dimension_numbers = #tpu.dot_dimension_numbers<[1], [0], [0], [1], [0, 0, 1, 1], [], []>} : vector<16x16xf32>, vector<16x32xf32>, vector<16x32xf32> -> vector<16x32xf32>
    %c0_27 = arith.constant 0 : index
    %c0_28 = arith.constant 0 : index
    %29 = vector.load %arg9[%c0_27, %c0_28] : memref<1x32xf32, #tpu.memory_space<vmem>>, vector<1x32xf32>
    %30 = vector.broadcast %29 : vector<1x32xf32> to vector<16x32xf32>
    %31 = arith.addf %28, %30 : vector<16x32xf32>
    %c0_29 = arith.constant 0 : index
    %c0_30 = arith.constant 0 : index
    %32 = vector.load %arg13[%c0_29, %c0_30] : memref<16x32xf32, #tpu.memory_space<vmem>>, vector<16x32xf32>
    tpu.vector_store %arg13[%c0_29, %c0_30], %31 {strides = array<i32>} : memref<16x32xf32, #tpu.memory_space<vmem>>, vector<16x32xf32>,
    return
  }
  func.func @transform_0(%arg0: i32) -> (i32, i32) {
    %c0_i32 = arith.constant 0 : i32
    %c0_i32_0 = arith.constant 0 : i32
    return %arg0, %c0_i32 : i32, i32
  }
  func.func @transform_1(%arg0: i32) -> (i32, i32) {
    %c0_i32 = arith.constant 0 : i32
    %c0_i32_0 = arith.constant 0 : i32
    %c0_i32_1 = arith.constant 0 : i32
    return %c0_i32, %c0_i32_0 : i32, i32
  }
  func.func @transform_2(%arg0: i32) -> (i32, i32) {
    %c0_i32 = arith.constant 0 : i32
    %c0_i32_0 = arith.constant 0 : i32
    %c0_i32_1 = arith.constant 0 : i32
    return %c0_i32, %c0_i32_0 : i32, i32
  }
  func.func @transform_3(%arg0: i32) -> (i32, i32) {
    %c0_i32 = arith.constant 0 : i32
    %c0_i32_0 = arith.constant 0 : i32
    %c0_i32_1 = arith.constant 0 : i32
    return %c0_i32, %c0_i32_0 : i32, i32
  }
  func.func @transform_4(%arg0: i32) -> (i32, i32) {
    %c0_i32 = arith.constant 0 : i32
    %c0_i32_0 = arith.constant 0 : i32
    %c0_i32_1 = arith.constant 0 : i32
    return %c0_i32, %c0_i32_0 : i32, i32
  }
  func.func @transform_5(%arg0: i32) -> (i32, i32) {
    %c0_i32 = arith.constant 0 : i32
    %c0_i32_0 = arith.constant 0 : i32
    %c0_i32_1 = arith.constant 0 : i32
    return %c0_i32, %c0_i32_0 : i32, i32
  }
  func.func @transform_6(%arg0: i32) -> (i32, i32) {
    %c0_i32 = arith.constant 0 : i32
    %c0_i32_0 = arith.constant 0 : i32
    %c0_i32_1 = arith.constant 0 : i32
    return %c0_i32, %c0_i32_0 : i32, i32
  }
  func.func @transform_7(%arg0: i32) -> (i32, i32) {
    %c0_i32 = arith.constant 0 : i32
    %c0_i32_0 = arith.constant 0 : i32
    %c0_i32_1 = arith.constant 0 : i32
    return %c0_i32, %c0_i32_0 : i32, i32
  }
  func.func @transform_8(%arg0: i32) -> (i32, i32) {
    %c0_i32 = arith.constant 0 : i32
    %c0_i32_0 = arith.constant 0 : i32
    %c0_i32_1 = arith.constant 0 : i32
    return %c0_i32, %c0_i32_0 : i32, i32
  }
  func.func @transform_9(%arg0: i32) -> (i32, i32) {
    %c0_i32 = arith.constant 0 : i32
    %c0_i32_0 = arith.constant 0 : i32
    return %arg0, %c0_i32 : i32, i32
  }
  func.func @transform_10(%arg0: i32) -> (i32, i32) {
    %c0_i32 = arith.constant 0 : i32
    %c0_i32_0 = arith.constant 0 : i32
    return %arg0, %c0_i32 : i32, i32
  }
  func.func @transform_11(%arg0: i32) -> (i32, i32) {
    %c0_i32 = arith.constant 0 : i32
    %c0_i32_0 = arith.constant 0 : i32
    return %arg0, %c0_i32 : i32, i32
  }
  func.func @transform_12(%arg0: i32) -> (i32, i32) {
    %c0_i32 = arith.constant 0 : i32
    %c0_i32_0 = arith.constant 0 : i32
    return %arg0, %c0_i32 : i32, i32
  }
}

module attributes {stable_mosaic.version = 11 : i64} {
  func.func @_recurrent_kernel(%arg0: i32, %arg1: i32, %arg2: memref<8x2x32xf32, #tpu.memory_space<vmem>>, %arg3: memref<8x2x32xf32, #tpu.memory_space<vmem>>, %arg4: memref<8x2x32xf32, #tpu.memory_space<vmem>>, %arg5: memref<8x2x32xf32, #tpu.memory_space<vmem>>, %arg6: memref<32x32xf32, #tpu.memory_space<vmem>>, %arg7: memref<32x32xf32, #tpu.memory_space<vmem>>, %arg8: memref<32x32xf32, #tpu.memory_space<vmem>>, %arg9: memref<1x32xf32, #tpu.memory_space<vmem>>, %arg10: memref<8x2x32xf32, #tpu.memory_space<vmem>>, %arg11: memref<2x32xf32, #tpu.memory_space<vmem>>) attributes {dimension_semantics = [#tpu.dimension_semantics<parallel>, #tpu.dimension_semantics<arbitrary>], iteration_bounds = array<i64: 1, 1>, scalar_prefetch = 0 : i64, scratch_operands = 1 : i64, tpu.core_type = #tpu.core_type<tc>, window_params = [{transform_indices = @transform_0, window_bounds = array<i64: 8, 2, 32>}, {transform_indices = @transform_1, window_bounds = array<i64: 8, 2, 32>}, {transform_indices = @transform_2, window_bounds = array<i64: 8, 2, 32>}, {transform_indices = @transform_3, window_bounds = array<i64: 8, 2, 32>}, {pipeline_mode = #tpu.pipeline_mode<synchronous>, transform_indices = @transform_4, window_bounds = array<i64: 32, 32>}, {pipeline_mode = #tpu.pipeline_mode<synchronous>, transform_indices = @transform_5, window_bounds = array<i64: 32, 32>}, {pipeline_mode = #tpu.pipeline_mode<synchronous>, transform_indices = @transform_6, window_bounds = array<i64: 32, 32>}, {pipeline_mode = #tpu.pipeline_mode<synchronous>, transform_indices = @transform_7, window_bounds = array<i64: 1, 32>}, {transform_indices = @transform_8, window_bounds = array<i64: 8, 2, 32>}]} {
    %c0_i32 = arith.constant 0 : i32
    %0 = arith.cmpi eq, %arg1, %c0_i32 : i32
    %1 = arith.extui %0 : i1 to i32
    %c0_i32_0 = arith.constant 0 : i32
    %2 = arith.cmpi ne, %1, %c0_i32_0 : i32
    scf.if %2 {
      %cst_140 = arith.constant 0.000000e+00 : f32
      %345 = vector.broadcast %cst_140 : f32 to vector<2x32xf32>
      %c0_141 = arith.constant 0 : index
      %c0_142 = arith.constant 0 : index
      %346 = vector.load %arg11[%c0_141, %c0_142] : memref<2x32xf32, #tpu.memory_space<vmem>>, vector<2x32xf32>
      tpu.vector_store %arg11[%c0_141, %c0_142], %345 {strides = array<i32>} : memref<2x32xf32, #tpu.memory_space<vmem>>, vector<2x32xf32>,
    } else {
    }
    %c0 = arith.constant 0 : index
    %c0_1 = arith.constant 0 : index
    %3 = vector.load %arg6[%c0, %c0_1] : memref<32x32xf32, #tpu.memory_space<vmem>>, vector<32x32xf32>
    %c0_2 = arith.constant 0 : index
    %c0_3 = arith.constant 0 : index
    %4 = vector.load %arg7[%c0_2, %c0_3] : memref<32x32xf32, #tpu.memory_space<vmem>>, vector<32x32xf32>
    %c0_4 = arith.constant 0 : index
    %c0_5 = arith.constant 0 : index
    %5 = vector.load %arg8[%c0_4, %c0_5] : memref<32x32xf32, #tpu.memory_space<vmem>>, vector<32x32xf32>
    %c0_6 = arith.constant 0 : index
    %c0_7 = arith.constant 0 : index
    %6 = vector.load %arg9[%c0_6, %c0_7] : memref<1x32xf32, #tpu.memory_space<vmem>>, vector<1x32xf32>
    %c0_8 = arith.constant 0 : index
    %c0_9 = arith.constant 0 : index
    %7 = vector.load %arg11[%c0_8, %c0_9] : memref<2x32xf32, #tpu.memory_space<vmem>>, vector<2x32xf32>
    %c0_i32_10 = arith.constant 0 : i32
    %cst = arith.constant dense<0.000000e+00> : vector<2x32xf32>
    %8 = tpu.matmul %7, %3, %cst {dimension_numbers = #tpu.dot_dimension_numbers<[1], [0], [0], [1], [0, 0, 1, 1], [], []>} : vector<2x32xf32>, vector<32x32xf32>, vector<2x32xf32> -> vector<2x32xf32>
    %cst_11 = arith.constant dense<0.000000e+00> : vector<2x32xf32>
    %9 = tpu.matmul %7, %4, %cst_11 {dimension_numbers = #tpu.dot_dimension_numbers<[1], [0], [0], [1], [0, 0, 1, 1], [], []>} : vector<2x32xf32>, vector<32x32xf32>, vector<2x32xf32> -> vector<2x32xf32>
    %cst_12 = arith.constant dense<0.000000e+00> : vector<2x32xf32>
    %10 = tpu.matmul %7, %5, %cst_12 {dimension_numbers = #tpu.dot_dimension_numbers<[1], [0], [0], [1], [0, 0, 1, 1], [], []>} : vector<2x32xf32>, vector<32x32xf32>, vector<2x32xf32> -> vector<2x32xf32>
    %11 = vector.broadcast %6 : vector<1x32xf32> to vector<2x32xf32>
    %12 = arith.addf %10, %11 : vector<2x32xf32>
    %13 = arith.index_cast %c0_i32_10 : i32 to index
    %c0_13 = arith.constant 0 : index
    %c0_14 = arith.constant 0 : index
    %14 = vector.load %arg3[%13, %c0_13, %c0_14] : memref<8x2x32xf32, #tpu.memory_space<vmem>>, vector<1x2x32xf32>
    %15 = vector.shape_cast %14 : vector<1x2x32xf32> to vector<2x32xf32>
    %16 = arith.addf %15, %8 : vector<2x32xf32>
    %17 = arith.negf %16 : vector<2x32xf32>
    %18 = math.exp %17 : vector<2x32xf32>
    %cst_15 = arith.constant 1.000000e+00 : f32
    %19 = vector.broadcast %cst_15 : f32 to vector<2x32xf32>
    %20 = arith.addf %19, %18 : vector<2x32xf32>
    %21 = arith.divf %19, %20 : vector<2x32xf32>
    %22 = arith.index_cast %c0_i32_10 : i32 to index
    %c0_16 = arith.constant 0 : index
    %c0_17 = arith.constant 0 : index
    %23 = vector.load %arg4[%22, %c0_16, %c0_17] : memref<8x2x32xf32, #tpu.memory_space<vmem>>, vector<1x2x32xf32>
    %24 = vector.shape_cast %23 : vector<1x2x32xf32> to vector<2x32xf32>
    %25 = arith.addf %24, %9 : vector<2x32xf32>
    %26 = arith.negf %25 : vector<2x32xf32>
    %27 = math.exp %26 : vector<2x32xf32>
    %cst_18 = arith.constant 1.000000e+00 : f32
    %28 = vector.broadcast %cst_18 : f32 to vector<2x32xf32>
    %29 = arith.addf %28, %27 : vector<2x32xf32>
    %30 = arith.divf %28, %29 : vector<2x32xf32>
    %31 = arith.index_cast %c0_i32_10 : i32 to index
    %c0_19 = arith.constant 0 : index
    %c0_20 = arith.constant 0 : index
    %32 = vector.load %arg5[%31, %c0_19, %c0_20] : memref<8x2x32xf32, #tpu.memory_space<vmem>>, vector<1x2x32xf32>
    %33 = vector.shape_cast %32 : vector<1x2x32xf32> to vector<2x32xf32>
    %34 = arith.mulf %21, %12 : vector<2x32xf32>
    %35 = arith.addf %33, %34 : vector<2x32xf32>
    %36 = math.tanh %35 : vector<2x32xf32>
    %cst_21 = arith.constant 1.000000e+00 : f32
    %37 = vector.broadcast %cst_21 : f32 to vector<2x32xf32>
    %38 = arith.subf %37, %30 : vector<2x32xf32>
    %39 = arith.mulf %38, %36 : vector<2x32xf32>
    %40 = arith.mulf %30, %7 : vector<2x32xf32>
    %41 = arith.addf %39, %40 : vector<2x32xf32>
    %42 = arith.index_cast %c0_i32_10 : i32 to index
    %c0_22 = arith.constant 0 : index
    %c0_23 = arith.constant 0 : index
    %43 = vector.load %arg2[%42, %c0_22, %c0_23] : memref<8x2x32xf32, #tpu.memory_space<vmem>>, vector<1x2x32xf32>
    %44 = vector.shape_cast %43 : vector<1x2x32xf32> to vector<2x32xf32>
    %45 = arith.mulf %44, %41 : vector<2x32xf32>
    %46 = arith.index_cast %c0_i32_10 : i32 to index
    %c0_24 = arith.constant 0 : index
    %c0_25 = arith.constant 0 : index
    %47 = vector.load %arg10[%46, %c0_24, %c0_25] : memref<8x2x32xf32, #tpu.memory_space<vmem>>, vector<1x2x32xf32>
    %48 = vector.shape_cast %47 : vector<1x2x32xf32> to vector<2x32xf32>
    %49 = vector.shape_cast %45 : vector<2x32xf32> to vector<1x2x32xf32>
    tpu.vector_store %arg10[%46, %c0_24, %c0_25], %49 {strides = array<i32>} : memref<8x2x32xf32, #tpu.memory_space<vmem>>, vector<1x2x32xf32>,
    %c1_i32 = arith.constant 1 : i32
    %cst_26 = arith.constant dense<0.000000e+00> : vector<2x32xf32>
    %50 = tpu.matmul %41, %3, %cst_26 {dimension_numbers = #tpu.dot_dimension_numbers<[1], [0], [0], [1], [0, 0, 1, 1], [], []>} : vector<2x32xf32>, vector<32x32xf32>, vector<2x32xf32> -> vector<2x32xf32>
    %cst_27 = arith.constant dense<0.000000e+00> : vector<2x32xf32>
    %51 = tpu.matmul %41, %4, %cst_27 {dimension_numbers = #tpu.dot_dimension_numbers<[1], [0], [0], [1], [0, 0, 1, 1], [], []>} : vector<2x32xf32>, vector<32x32xf32>, vector<2x32xf32> -> vector<2x32xf32>
    %cst_28 = arith.constant dense<0.000000e+00> : vector<2x32xf32>
    %52 = tpu.matmul %41, %5, %cst_28 {dimension_numbers = #tpu.dot_dimension_numbers<[1], [0], [0], [1], [0, 0, 1, 1], [], []>} : vector<2x32xf32>, vector<32x32xf32>, vector<2x32xf32> -> vector<2x32xf32>
    %53 = vector.broadcast %6 : vector<1x32xf32> to vector<2x32xf32>
    %54 = arith.addf %52, %53 : vector<2x32xf32>
    %55 = arith.index_cast %c1_i32 : i32 to index
    %c0_29 = arith.constant 0 : index
    %c0_30 = arith.constant 0 : index
    %56 = vector.load %arg3[%55, %c0_29, %c0_30] : memref<8x2x32xf32, #tpu.memory_space<vmem>>, vector<1x2x32xf32>
    %57 = vector.shape_cast %56 : vector<1x2x32xf32> to vector<2x32xf32>
    %58 = arith.addf %57, %50 : vector<2x32xf32>
    %59 = arith.negf %58 : vector<2x32xf32>
    %60 = math.exp %59 : vector<2x32xf32>
    %cst_31 = arith.constant 1.000000e+00 : f32
    %61 = vector.broadcast %cst_31 : f32 to vector<2x32xf32>
    %62 = arith.addf %61, %60 : vector<2x32xf32>
    %63 = arith.divf %61, %62 : vector<2x32xf32>
    %64 = arith.index_cast %c1_i32 : i32 to index
    %c0_32 = arith.constant 0 : index
    %c0_33 = arith.constant 0 : index
    %65 = vector.load %arg4[%64, %c0_32, %c0_33] : memref<8x2x32xf32, #tpu.memory_space<vmem>>, vector<1x2x32xf32>
    %66 = vector.shape_cast %65 : vector<1x2x32xf32> to vector<2x32xf32>
    %67 = arith.addf %66, %51 : vector<2x32xf32>
    %68 = arith.negf %67 : vector<2x32xf32>
    %69 = math.exp %68 : vector<2x32xf32>
    %cst_34 = arith.constant 1.000000e+00 : f32
    %70 = vector.broadcast %cst_34 : f32 to vector<2x32xf32>
    %71 = arith.addf %70, %69 : vector<2x32xf32>
    %72 = arith.divf %70, %71 : vector<2x32xf32>
    %73 = arith.index_cast %c1_i32 : i32 to index
    %c0_35 = arith.constant 0 : index
    %c0_36 = arith.constant 0 : index
    %74 = vector.load %arg5[%73, %c0_35, %c0_36] : memref<8x2x32xf32, #tpu.memory_space<vmem>>, vector<1x2x32xf32>
    %75 = vector.shape_cast %74 : vector<1x2x32xf32> to vector<2x32xf32>
    %76 = arith.mulf %63, %54 : vector<2x32xf32>
    %77 = arith.addf %75, %76 : vector<2x32xf32>
    %78 = math.tanh %77 : vector<2x32xf32>
    %cst_37 = arith.constant 1.000000e+00 : f32
    %79 = vector.broadcast %cst_37 : f32 to vector<2x32xf32>
    %80 = arith.subf %79, %72 : vector<2x32xf32>
    %81 = arith.mulf %80, %78 : vector<2x32xf32>
    %82 = arith.mulf %72, %41 : vector<2x32xf32>
    %83 = arith.addf %81, %82 : vector<2x32xf32>
    %84 = arith.index_cast %c1_i32 : i32 to index
    %c0_38 = arith.constant 0 : index
    %c0_39 = arith.constant 0 : index
    %85 = vector.load %arg2[%84, %c0_38, %c0_39] : memref<8x2x32xf32, #tpu.memory_space<vmem>>, vector<1x2x32xf32>
    %86 = vector.shape_cast %85 : vector<1x2x32xf32> to vector<2x32xf32>
    %87 = arith.mulf %86, %83 : vector<2x32xf32>
    %88 = arith.index_cast %c1_i32 : i32 to index
    %c0_40 = arith.constant 0 : index
    %c0_41 = arith.constant 0 : index
    %89 = vector.load %arg10[%88, %c0_40, %c0_41] : memref<8x2x32xf32, #tpu.memory_space<vmem>>, vector<1x2x32xf32>
    %90 = vector.shape_cast %89 : vector<1x2x32xf32> to vector<2x32xf32>
    %91 = vector.shape_cast %87 : vector<2x32xf32> to vector<1x2x32xf32>
    tpu.vector_store %arg10[%88, %c0_40, %c0_41], %91 {strides = array<i32>} : memref<8x2x32xf32, #tpu.memory_space<vmem>>, vector<1x2x32xf32>,
    %c2_i32 = arith.constant 2 : i32
    %cst_42 = arith.constant dense<0.000000e+00> : vector<2x32xf32>
    %92 = tpu.matmul %83, %3, %cst_42 {dimension_numbers = #tpu.dot_dimension_numbers<[1], [0], [0], [1], [0, 0, 1, 1], [], []>} : vector<2x32xf32>, vector<32x32xf32>, vector<2x32xf32> -> vector<2x32xf32>
    %cst_43 = arith.constant dense<0.000000e+00> : vector<2x32xf32>
    %93 = tpu.matmul %83, %4, %cst_43 {dimension_numbers = #tpu.dot_dimension_numbers<[1], [0], [0], [1], [0, 0, 1, 1], [], []>} : vector<2x32xf32>, vector<32x32xf32>, vector<2x32xf32> -> vector<2x32xf32>
    %cst_44 = arith.constant dense<0.000000e+00> : vector<2x32xf32>
    %94 = tpu.matmul %83, %5, %cst_44 {dimension_numbers = #tpu.dot_dimension_numbers<[1], [0], [0], [1], [0, 0, 1, 1], [], []>} : vector<2x32xf32>, vector<32x32xf32>, vector<2x32xf32> -> vector<2x32xf32>
    %95 = vector.broadcast %6 : vector<1x32xf32> to vector<2x32xf32>
    %96 = arith.addf %94, %95 : vector<2x32xf32>
    %97 = arith.index_cast %c2_i32 : i32 to index
    %c0_45 = arith.constant 0 : index
    %c0_46 = arith.constant 0 : index
    %98 = vector.load %arg3[%97, %c0_45, %c0_46] : memref<8x2x32xf32, #tpu.memory_space<vmem>>, vector<1x2x32xf32>
    %99 = vector.shape_cast %98 : vector<1x2x32xf32> to vector<2x32xf32>
    %100 = arith.addf %99, %92 : vector<2x32xf32>
    %101 = arith.negf %100 : vector<2x32xf32>
    %102 = math.exp %101 : vector<2x32xf32>
    %cst_47 = arith.constant 1.000000e+00 : f32
    %103 = vector.broadcast %cst_47 : f32 to vector<2x32xf32>
    %104 = arith.addf %103, %102 : vector<2x32xf32>
    %105 = arith.divf %103, %104 : vector<2x32xf32>
    %106 = arith.index_cast %c2_i32 : i32 to index
    %c0_48 = arith.constant 0 : index
    %c0_49 = arith.constant 0 : index
    %107 = vector.load %arg4[%106, %c0_48, %c0_49] : memref<8x2x32xf32, #tpu.memory_space<vmem>>, vector<1x2x32xf32>
    %108 = vector.shape_cast %107 : vector<1x2x32xf32> to vector<2x32xf32>
    %109 = arith.addf %108, %93 : vector<2x32xf32>
    %110 = arith.negf %109 : vector<2x32xf32>
    %111 = math.exp %110 : vector<2x32xf32>
    %cst_50 = arith.constant 1.000000e+00 : f32
    %112 = vector.broadcast %cst_50 : f32 to vector<2x32xf32>
    %113 = arith.addf %112, %111 : vector<2x32xf32>
    %114 = arith.divf %112, %113 : vector<2x32xf32>
    %115 = arith.index_cast %c2_i32 : i32 to index
    %c0_51 = arith.constant 0 : index
    %c0_52 = arith.constant 0 : index
    %116 = vector.load %arg5[%115, %c0_51, %c0_52] : memref<8x2x32xf32, #tpu.memory_space<vmem>>, vector<1x2x32xf32>
    %117 = vector.shape_cast %116 : vector<1x2x32xf32> to vector<2x32xf32>
    %118 = arith.mulf %105, %96 : vector<2x32xf32>
    %119 = arith.addf %117, %118 : vector<2x32xf32>
    %120 = math.tanh %119 : vector<2x32xf32>
    %cst_53 = arith.constant 1.000000e+00 : f32
    %121 = vector.broadcast %cst_53 : f32 to vector<2x32xf32>
    %122 = arith.subf %121, %114 : vector<2x32xf32>
    %123 = arith.mulf %122, %120 : vector<2x32xf32>
    %124 = arith.mulf %114, %83 : vector<2x32xf32>
    %125 = arith.addf %123, %124 : vector<2x32xf32>
    %126 = arith.index_cast %c2_i32 : i32 to index
    %c0_54 = arith.constant 0 : index
    %c0_55 = arith.constant 0 : index
    %127 = vector.load %arg2[%126, %c0_54, %c0_55] : memref<8x2x32xf32, #tpu.memory_space<vmem>>, vector<1x2x32xf32>
    %128 = vector.shape_cast %127 : vector<1x2x32xf32> to vector<2x32xf32>
    %129 = arith.mulf %128, %125 : vector<2x32xf32>
    %130 = arith.index_cast %c2_i32 : i32 to index
    %c0_56 = arith.constant 0 : index
    %c0_57 = arith.constant 0 : index
    %131 = vector.load %arg10[%130, %c0_56, %c0_57] : memref<8x2x32xf32, #tpu.memory_space<vmem>>, vector<1x2x32xf32>
    %132 = vector.shape_cast %131 : vector<1x2x32xf32> to vector<2x32xf32>
    %133 = vector.shape_cast %129 : vector<2x32xf32> to vector<1x2x32xf32>
    tpu.vector_store %arg10[%130, %c0_56, %c0_57], %133 {strides = array<i32>} : memref<8x2x32xf32, #tpu.memory_space<vmem>>, vector<1x2x32xf32>,
    %c3_i32 = arith.constant 3 : i32
    %cst_58 = arith.constant dense<0.000000e+00> : vector<2x32xf32>
    %134 = tpu.matmul %125, %3, %cst_58 {dimension_numbers = #tpu.dot_dimension_numbers<[1], [0], [0], [1], [0, 0, 1, 1], [], []>} : vector<2x32xf32>, vector<32x32xf32>, vector<2x32xf32> -> vector<2x32xf32>
    %cst_59 = arith.constant dense<0.000000e+00> : vector<2x32xf32>
    %135 = tpu.matmul %125, %4, %cst_59 {dimension_numbers = #tpu.dot_dimension_numbers<[1], [0], [0], [1], [0, 0, 1, 1], [], []>} : vector<2x32xf32>, vector<32x32xf32>, vector<2x32xf32> -> vector<2x32xf32>
    %cst_60 = arith.constant dense<0.000000e+00> : vector<2x32xf32>
    %136 = tpu.matmul %125, %5, %cst_60 {dimension_numbers = #tpu.dot_dimension_numbers<[1], [0], [0], [1], [0, 0, 1, 1], [], []>} : vector<2x32xf32>, vector<32x32xf32>, vector<2x32xf32> -> vector<2x32xf32>
    %137 = vector.broadcast %6 : vector<1x32xf32> to vector<2x32xf32>
    %138 = arith.addf %136, %137 : vector<2x32xf32>
    %139 = arith.index_cast %c3_i32 : i32 to index
    %c0_61 = arith.constant 0 : index
    %c0_62 = arith.constant 0 : index
    %140 = vector.load %arg3[%139, %c0_61, %c0_62] : memref<8x2x32xf32, #tpu.memory_space<vmem>>, vector<1x2x32xf32>
    %141 = vector.shape_cast %140 : vector<1x2x32xf32> to vector<2x32xf32>
    %142 = arith.addf %141, %134 : vector<2x32xf32>
    %143 = arith.negf %142 : vector<2x32xf32>
    %144 = math.exp %143 : vector<2x32xf32>
    %cst_63 = arith.constant 1.000000e+00 : f32
    %145 = vector.broadcast %cst_63 : f32 to vector<2x32xf32>
    %146 = arith.addf %145, %144 : vector<2x32xf32>
    %147 = arith.divf %145, %146 : vector<2x32xf32>
    %148 = arith.index_cast %c3_i32 : i32 to index
    %c0_64 = arith.constant 0 : index
    %c0_65 = arith.constant 0 : index
    %149 = vector.load %arg4[%148, %c0_64, %c0_65] : memref<8x2x32xf32, #tpu.memory_space<vmem>>, vector<1x2x32xf32>
    %150 = vector.shape_cast %149 : vector<1x2x32xf32> to vector<2x32xf32>
    %151 = arith.addf %150, %135 : vector<2x32xf32>
    %152 = arith.negf %151 : vector<2x32xf32>
    %153 = math.exp %152 : vector<2x32xf32>
    %cst_66 = arith.constant 1.000000e+00 : f32
    %154 = vector.broadcast %cst_66 : f32 to vector<2x32xf32>
    %155 = arith.addf %154, %153 : vector<2x32xf32>
    %156 = arith.divf %154, %155 : vector<2x32xf32>
    %157 = arith.index_cast %c3_i32 : i32 to index
    %c0_67 = arith.constant 0 : index
    %c0_68 = arith.constant 0 : index
    %158 = vector.load %arg5[%157, %c0_67, %c0_68] : memref<8x2x32xf32, #tpu.memory_space<vmem>>, vector<1x2x32xf32>
    %159 = vector.shape_cast %158 : vector<1x2x32xf32> to vector<2x32xf32>
    %160 = arith.mulf %147, %138 : vector<2x32xf32>
    %161 = arith.addf %159, %160 : vector<2x32xf32>
    %162 = math.tanh %161 : vector<2x32xf32>
    %cst_69 = arith.constant 1.000000e+00 : f32
    %163 = vector.broadcast %cst_69 : f32 to vector<2x32xf32>
    %164 = arith.subf %163, %156 : vector<2x32xf32>
    %165 = arith.mulf %164, %162 : vector<2x32xf32>
    %166 = arith.mulf %156, %125 : vector<2x32xf32>
    %167 = arith.addf %165, %166 : vector<2x32xf32>
    %168 = arith.index_cast %c3_i32 : i32 to index
    %c0_70 = arith.constant 0 : index
    %c0_71 = arith.constant 0 : index
    %169 = vector.load %arg2[%168, %c0_70, %c0_71] : memref<8x2x32xf32, #tpu.memory_space<vmem>>, vector<1x2x32xf32>
    %170 = vector.shape_cast %169 : vector<1x2x32xf32> to vector<2x32xf32>
    %171 = arith.mulf %170, %167 : vector<2x32xf32>
    %172 = arith.index_cast %c3_i32 : i32 to index
    %c0_72 = arith.constant 0 : index
    %c0_73 = arith.constant 0 : index
    %173 = vector.load %arg10[%172, %c0_72, %c0_73] : memref<8x2x32xf32, #tpu.memory_space<vmem>>, vector<1x2x32xf32>
    %174 = vector.shape_cast %173 : vector<1x2x32xf32> to vector<2x32xf32>
    %175 = vector.shape_cast %171 : vector<2x32xf32> to vector<1x2x32xf32>
    tpu.vector_store %arg10[%172, %c0_72, %c0_73], %175 {strides = array<i32>} : memref<8x2x32xf32, #tpu.memory_space<vmem>>, vector<1x2x32xf32>,
    %c4_i32 = arith.constant 4 : i32
    %cst_74 = arith.constant dense<0.000000e+00> : vector<2x32xf32>
    %176 = tpu.matmul %167, %3, %cst_74 {dimension_numbers = #tpu.dot_dimension_numbers<[1], [0], [0], [1], [0, 0, 1, 1], [], []>} : vector<2x32xf32>, vector<32x32xf32>, vector<2x32xf32> -> vector<2x32xf32>
    %cst_75 = arith.constant dense<0.000000e+00> : vector<2x32xf32>
    %177 = tpu.matmul %167, %4, %cst_75 {dimension_numbers = #tpu.dot_dimension_numbers<[1], [0], [0], [1], [0, 0, 1, 1], [], []>} : vector<2x32xf32>, vector<32x32xf32>, vector<2x32xf32> -> vector<2x32xf32>
    %cst_76 = arith.constant dense<0.000000e+00> : vector<2x32xf32>
    %178 = tpu.matmul %167, %5, %cst_76 {dimension_numbers = #tpu.dot_dimension_numbers<[1], [0], [0], [1], [0, 0, 1, 1], [], []>} : vector<2x32xf32>, vector<32x32xf32>, vector<2x32xf32> -> vector<2x32xf32>
    %179 = vector.broadcast %6 : vector<1x32xf32> to vector<2x32xf32>
    %180 = arith.addf %178, %179 : vector<2x32xf32>
    %181 = arith.index_cast %c4_i32 : i32 to index
    %c0_77 = arith.constant 0 : index
    %c0_78 = arith.constant 0 : index
    %182 = vector.load %arg3[%181, %c0_77, %c0_78] : memref<8x2x32xf32, #tpu.memory_space<vmem>>, vector<1x2x32xf32>
    %183 = vector.shape_cast %182 : vector<1x2x32xf32> to vector<2x32xf32>
    %184 = arith.addf %183, %176 : vector<2x32xf32>
    %185 = arith.negf %184 : vector<2x32xf32>
    %186 = math.exp %185 : vector<2x32xf32>
    %cst_79 = arith.constant 1.000000e+00 : f32
    %187 = vector.broadcast %cst_79 : f32 to vector<2x32xf32>
    %188 = arith.addf %187, %186 : vector<2x32xf32>
    %189 = arith.divf %187, %188 : vector<2x32xf32>
    %190 = arith.index_cast %c4_i32 : i32 to index
    %c0_80 = arith.constant 0 : index
    %c0_81 = arith.constant 0 : index
    %191 = vector.load %arg4[%190, %c0_80, %c0_81] : memref<8x2x32xf32, #tpu.memory_space<vmem>>, vector<1x2x32xf32>
    %192 = vector.shape_cast %191 : vector<1x2x32xf32> to vector<2x32xf32>
    %193 = arith.addf %192, %177 : vector<2x32xf32>
    %194 = arith.negf %193 : vector<2x32xf32>
    %195 = math.exp %194 : vector<2x32xf32>
    %cst_82 = arith.constant 1.000000e+00 : f32
    %196 = vector.broadcast %cst_82 : f32 to vector<2x32xf32>
    %197 = arith.addf %196, %195 : vector<2x32xf32>
    %198 = arith.divf %196, %197 : vector<2x32xf32>
    %199 = arith.index_cast %c4_i32 : i32 to index
    %c0_83 = arith.constant 0 : index
    %c0_84 = arith.constant 0 : index
    %200 = vector.load %arg5[%199, %c0_83, %c0_84] : memref<8x2x32xf32, #tpu.memory_space<vmem>>, vector<1x2x32xf32>
    %201 = vector.shape_cast %200 : vector<1x2x32xf32> to vector<2x32xf32>
    %202 = arith.mulf %189, %180 : vector<2x32xf32>
    %203 = arith.addf %201, %202 : vector<2x32xf32>
    %204 = math.tanh %203 : vector<2x32xf32>
    %cst_85 = arith.constant 1.000000e+00 : f32
    %205 = vector.broadcast %cst_85 : f32 to vector<2x32xf32>
    %206 = arith.subf %205, %198 : vector<2x32xf32>
    %207 = arith.mulf %206, %204 : vector<2x32xf32>
    %208 = arith.mulf %198, %167 : vector<2x32xf32>
    %209 = arith.addf %207, %208 : vector<2x32xf32>
    %210 = arith.index_cast %c4_i32 : i32 to index
    %c0_86 = arith.constant 0 : index
    %c0_87 = arith.constant 0 : index
    %211 = vector.load %arg2[%210, %c0_86, %c0_87] : memref<8x2x32xf32, #tpu.memory_space<vmem>>, vector<1x2x32xf32>
    %212 = vector.shape_cast %211 : vector<1x2x32xf32> to vector<2x32xf32>
    %213 = arith.mulf %212, %209 : vector<2x32xf32>
    %214 = arith.index_cast %c4_i32 : i32 to index
    %c0_88 = arith.constant 0 : index
    %c0_89 = arith.constant 0 : index
    %215 = vector.load %arg10[%214, %c0_88, %c0_89] : memref<8x2x32xf32, #tpu.memory_space<vmem>>, vector<1x2x32xf32>
    %216 = vector.shape_cast %215 : vector<1x2x32xf32> to vector<2x32xf32>
    %217 = vector.shape_cast %213 : vector<2x32xf32> to vector<1x2x32xf32>
    tpu.vector_store %arg10[%214, %c0_88, %c0_89], %217 {strides = array<i32>} : memref<8x2x32xf32, #tpu.memory_space<vmem>>, vector<1x2x32xf32>,
    %c5_i32 = arith.constant 5 : i32
    %cst_90 = arith.constant dense<0.000000e+00> : vector<2x32xf32>
    %218 = tpu.matmul %209, %3, %cst_90 {dimension_numbers = #tpu.dot_dimension_numbers<[1], [0], [0], [1], [0, 0, 1, 1], [], []>} : vector<2x32xf32>, vector<32x32xf32>, vector<2x32xf32> -> vector<2x32xf32>
    %cst_91 = arith.constant dense<0.000000e+00> : vector<2x32xf32>
    %219 = tpu.matmul %209, %4, %cst_91 {dimension_numbers = #tpu.dot_dimension_numbers<[1], [0], [0], [1], [0, 0, 1, 1], [], []>} : vector<2x32xf32>, vector<32x32xf32>, vector<2x32xf32> -> vector<2x32xf32>
    %cst_92 = arith.constant dense<0.000000e+00> : vector<2x32xf32>
    %220 = tpu.matmul %209, %5, %cst_92 {dimension_numbers = #tpu.dot_dimension_numbers<[1], [0], [0], [1], [0, 0, 1, 1], [], []>} : vector<2x32xf32>, vector<32x32xf32>, vector<2x32xf32> -> vector<2x32xf32>
    %221 = vector.broadcast %6 : vector<1x32xf32> to vector<2x32xf32>
    %222 = arith.addf %220, %221 : vector<2x32xf32>
    %223 = arith.index_cast %c5_i32 : i32 to index
    %c0_93 = arith.constant 0 : index
    %c0_94 = arith.constant 0 : index
    %224 = vector.load %arg3[%223, %c0_93, %c0_94] : memref<8x2x32xf32, #tpu.memory_space<vmem>>, vector<1x2x32xf32>
    %225 = vector.shape_cast %224 : vector<1x2x32xf32> to vector<2x32xf32>
    %226 = arith.addf %225, %218 : vector<2x32xf32>
    %227 = arith.negf %226 : vector<2x32xf32>
    %228 = math.exp %227 : vector<2x32xf32>
    %cst_95 = arith.constant 1.000000e+00 : f32
    %229 = vector.broadcast %cst_95 : f32 to vector<2x32xf32>
    %230 = arith.addf %229, %228 : vector<2x32xf32>
    %231 = arith.divf %229, %230 : vector<2x32xf32>
    %232 = arith.index_cast %c5_i32 : i32 to index
    %c0_96 = arith.constant 0 : index
    %c0_97 = arith.constant 0 : index
    %233 = vector.load %arg4[%232, %c0_96, %c0_97] : memref<8x2x32xf32, #tpu.memory_space<vmem>>, vector<1x2x32xf32>
    %234 = vector.shape_cast %233 : vector<1x2x32xf32> to vector<2x32xf32>
    %235 = arith.addf %234, %219 : vector<2x32xf32>
    %236 = arith.negf %235 : vector<2x32xf32>
    %237 = math.exp %236 : vector<2x32xf32>
    %cst_98 = arith.constant 1.000000e+00 : f32
    %238 = vector.broadcast %cst_98 : f32 to vector<2x32xf32>
    %239 = arith.addf %238, %237 : vector<2x32xf32>
    %240 = arith.divf %238, %239 : vector<2x32xf32>
    %241 = arith.index_cast %c5_i32 : i32 to index
    %c0_99 = arith.constant 0 : index
    %c0_100 = arith.constant 0 : index
    %242 = vector.load %arg5[%241, %c0_99, %c0_100] : memref<8x2x32xf32, #tpu.memory_space<vmem>>, vector<1x2x32xf32>
    %243 = vector.shape_cast %242 : vector<1x2x32xf32> to vector<2x32xf32>
    %244 = arith.mulf %231, %222 : vector<2x32xf32>
    %245 = arith.addf %243, %244 : vector<2x32xf32>
    %246 = math.tanh %245 : vector<2x32xf32>
    %cst_101 = arith.constant 1.000000e+00 : f32
    %247 = vector.broadcast %cst_101 : f32 to vector<2x32xf32>
    %248 = arith.subf %247, %240 : vector<2x32xf32>
    %249 = arith.mulf %248, %246 : vector<2x32xf32>
    %250 = arith.mulf %240, %209 : vector<2x32xf32>
    %251 = arith.addf %249, %250 : vector<2x32xf32>
    %252 = arith.index_cast %c5_i32 : i32 to index
    %c0_102 = arith.constant 0 : index
    %c0_103 = arith.constant 0 : index
    %253 = vector.load %arg2[%252, %c0_102, %c0_103] : memref<8x2x32xf32, #tpu.memory_space<vmem>>, vector<1x2x32xf32>
    %254 = vector.shape_cast %253 : vector<1x2x32xf32> to vector<2x32xf32>
    %255 = arith.mulf %254, %251 : vector<2x32xf32>
    %256 = arith.index_cast %c5_i32 : i32 to index
    %c0_104 = arith.constant 0 : index
    %c0_105 = arith.constant 0 : index
    %257 = vector.load %arg10[%256, %c0_104, %c0_105] : memref<8x2x32xf32, #tpu.memory_space<vmem>>, vector<1x2x32xf32>
    %258 = vector.shape_cast %257 : vector<1x2x32xf32> to vector<2x32xf32>
    %259 = vector.shape_cast %255 : vector<2x32xf32> to vector<1x2x32xf32>
    tpu.vector_store %arg10[%256, %c0_104, %c0_105], %259 {strides = array<i32>} : memref<8x2x32xf32, #tpu.memory_space<vmem>>, vector<1x2x32xf32>,
    %c6_i32 = arith.constant 6 : i32
    %cst_106 = arith.constant dense<0.000000e+00> : vector<2x32xf32>
    %260 = tpu.matmul %251, %3, %cst_106 {dimension_numbers = #tpu.dot_dimension_numbers<[1], [0], [0], [1], [0, 0, 1, 1], [], []>} : vector<2x32xf32>, vector<32x32xf32>, vector<2x32xf32> -> vector<2x32xf32>
    %cst_107 = arith.constant dense<0.000000e+00> : vector<2x32xf32>
    %261 = tpu.matmul %251, %4, %cst_107 {dimension_numbers = #tpu.dot_dimension_numbers<[1], [0], [0], [1], [0, 0, 1, 1], [], []>} : vector<2x32xf32>, vector<32x32xf32>, vector<2x32xf32> -> vector<2x32xf32>
    %cst_108 = arith.constant dense<0.000000e+00> : vector<2x32xf32>
    %262 = tpu.matmul %251, %5, %cst_108 {dimension_numbers = #tpu.dot_dimension_numbers<[1], [0], [0], [1], [0, 0, 1, 1], [], []>} : vector<2x32xf32>, vector<32x32xf32>, vector<2x32xf32> -> vector<2x32xf32>
    %263 = vector.broadcast %6 : vector<1x32xf32> to vector<2x32xf32>
    %264 = arith.addf %262, %263 : vector<2x32xf32>
    %265 = arith.index_cast %c6_i32 : i32 to index
    %c0_109 = arith.constant 0 : index
    %c0_110 = arith.constant 0 : index
    %266 = vector.load %arg3[%265, %c0_109, %c0_110] : memref<8x2x32xf32, #tpu.memory_space<vmem>>, vector<1x2x32xf32>
    %267 = vector.shape_cast %266 : vector<1x2x32xf32> to vector<2x32xf32>
    %268 = arith.addf %267, %260 : vector<2x32xf32>
    %269 = arith.negf %268 : vector<2x32xf32>
    %270 = math.exp %269 : vector<2x32xf32>
    %cst_111 = arith.constant 1.000000e+00 : f32
    %271 = vector.broadcast %cst_111 : f32 to vector<2x32xf32>
    %272 = arith.addf %271, %270 : vector<2x32xf32>
    %273 = arith.divf %271, %272 : vector<2x32xf32>
    %274 = arith.index_cast %c6_i32 : i32 to index
    %c0_112 = arith.constant 0 : index
    %c0_113 = arith.constant 0 : index
    %275 = vector.load %arg4[%274, %c0_112, %c0_113] : memref<8x2x32xf32, #tpu.memory_space<vmem>>, vector<1x2x32xf32>
    %276 = vector.shape_cast %275 : vector<1x2x32xf32> to vector<2x32xf32>
    %277 = arith.addf %276, %261 : vector<2x32xf32>
    %278 = arith.negf %277 : vector<2x32xf32>
    %279 = math.exp %278 : vector<2x32xf32>
    %cst_114 = arith.constant 1.000000e+00 : f32
    %280 = vector.broadcast %cst_114 : f32 to vector<2x32xf32>
    %281 = arith.addf %280, %279 : vector<2x32xf32>
    %282 = arith.divf %280, %281 : vector<2x32xf32>
    %283 = arith.index_cast %c6_i32 : i32 to index
    %c0_115 = arith.constant 0 : index
    %c0_116 = arith.constant 0 : index
    %284 = vector.load %arg5[%283, %c0_115, %c0_116] : memref<8x2x32xf32, #tpu.memory_space<vmem>>, vector<1x2x32xf32>
    %285 = vector.shape_cast %284 : vector<1x2x32xf32> to vector<2x32xf32>
    %286 = arith.mulf %273, %264 : vector<2x32xf32>
    %287 = arith.addf %285, %286 : vector<2x32xf32>
    %288 = math.tanh %287 : vector<2x32xf32>
    %cst_117 = arith.constant 1.000000e+00 : f32
    %289 = vector.broadcast %cst_117 : f32 to vector<2x32xf32>
    %290 = arith.subf %289, %282 : vector<2x32xf32>
    %291 = arith.mulf %290, %288 : vector<2x32xf32>
    %292 = arith.mulf %282, %251 : vector<2x32xf32>
    %293 = arith.addf %291, %292 : vector<2x32xf32>
    %294 = arith.index_cast %c6_i32 : i32 to index
    %c0_118 = arith.constant 0 : index
    %c0_119 = arith.constant 0 : index
    %295 = vector.load %arg2[%294, %c0_118, %c0_119] : memref<8x2x32xf32, #tpu.memory_space<vmem>>, vector<1x2x32xf32>
    %296 = vector.shape_cast %295 : vector<1x2x32xf32> to vector<2x32xf32>
    %297 = arith.mulf %296, %293 : vector<2x32xf32>
    %298 = arith.index_cast %c6_i32 : i32 to index
    %c0_120 = arith.constant 0 : index
    %c0_121 = arith.constant 0 : index
    %299 = vector.load %arg10[%298, %c0_120, %c0_121] : memref<8x2x32xf32, #tpu.memory_space<vmem>>, vector<1x2x32xf32>
    %300 = vector.shape_cast %299 : vector<1x2x32xf32> to vector<2x32xf32>
    %301 = vector.shape_cast %297 : vector<2x32xf32> to vector<1x2x32xf32>
    tpu.vector_store %arg10[%298, %c0_120, %c0_121], %301 {strides = array<i32>} : memref<8x2x32xf32, #tpu.memory_space<vmem>>, vector<1x2x32xf32>,
    %c7_i32 = arith.constant 7 : i32
    %cst_122 = arith.constant dense<0.000000e+00> : vector<2x32xf32>
    %302 = tpu.matmul %293, %3, %cst_122 {dimension_numbers = #tpu.dot_dimension_numbers<[1], [0], [0], [1], [0, 0, 1, 1], [], []>} : vector<2x32xf32>, vector<32x32xf32>, vector<2x32xf32> -> vector<2x32xf32>
    %cst_123 = arith.constant dense<0.000000e+00> : vector<2x32xf32>
    %303 = tpu.matmul %293, %4, %cst_123 {dimension_numbers = #tpu.dot_dimension_numbers<[1], [0], [0], [1], [0, 0, 1, 1], [], []>} : vector<2x32xf32>, vector<32x32xf32>, vector<2x32xf32> -> vector<2x32xf32>
    %cst_124 = arith.constant dense<0.000000e+00> : vector<2x32xf32>
    %304 = tpu.matmul %293, %5, %cst_124 {dimension_numbers = #tpu.dot_dimension_numbers<[1], [0], [0], [1], [0, 0, 1, 1], [], []>} : vector<2x32xf32>, vector<32x32xf32>, vector<2x32xf32> -> vector<2x32xf32>
    %305 = vector.broadcast %6 : vector<1x32xf32> to vector<2x32xf32>
    %306 = arith.addf %304, %305 : vector<2x32xf32>
    %307 = arith.index_cast %c7_i32 : i32 to index
    %c0_125 = arith.constant 0 : index
    %c0_126 = arith.constant 0 : index
    %308 = vector.load %arg3[%307, %c0_125, %c0_126] : memref<8x2x32xf32, #tpu.memory_space<vmem>>, vector<1x2x32xf32>
    %309 = vector.shape_cast %308 : vector<1x2x32xf32> to vector<2x32xf32>
    %310 = arith.addf %309, %302 : vector<2x32xf32>
    %311 = arith.negf %310 : vector<2x32xf32>
    %312 = math.exp %311 : vector<2x32xf32>
    %cst_127 = arith.constant 1.000000e+00 : f32
    %313 = vector.broadcast %cst_127 : f32 to vector<2x32xf32>
    %314 = arith.addf %313, %312 : vector<2x32xf32>
    %315 = arith.divf %313, %314 : vector<2x32xf32>
    %316 = arith.index_cast %c7_i32 : i32 to index
    %c0_128 = arith.constant 0 : index
    %c0_129 = arith.constant 0 : index
    %317 = vector.load %arg4[%316, %c0_128, %c0_129] : memref<8x2x32xf32, #tpu.memory_space<vmem>>, vector<1x2x32xf32>
    %318 = vector.shape_cast %317 : vector<1x2x32xf32> to vector<2x32xf32>
    %319 = arith.addf %318, %303 : vector<2x32xf32>
    %320 = arith.negf %319 : vector<2x32xf32>
    %321 = math.exp %320 : vector<2x32xf32>
    %cst_130 = arith.constant 1.000000e+00 : f32
    %322 = vector.broadcast %cst_130 : f32 to vector<2x32xf32>
    %323 = arith.addf %322, %321 : vector<2x32xf32>
    %324 = arith.divf %322, %323 : vector<2x32xf32>
    %325 = arith.index_cast %c7_i32 : i32 to index
    %c0_131 = arith.constant 0 : index
    %c0_132 = arith.constant 0 : index
    %326 = vector.load %arg5[%325, %c0_131, %c0_132] : memref<8x2x32xf32, #tpu.memory_space<vmem>>, vector<1x2x32xf32>
    %327 = vector.shape_cast %326 : vector<1x2x32xf32> to vector<2x32xf32>
    %328 = arith.mulf %315, %306 : vector<2x32xf32>
    %329 = arith.addf %327, %328 : vector<2x32xf32>
    %330 = math.tanh %329 : vector<2x32xf32>
    %cst_133 = arith.constant 1.000000e+00 : f32
    %331 = vector.broadcast %cst_133 : f32 to vector<2x32xf32>
    %332 = arith.subf %331, %324 : vector<2x32xf32>
    %333 = arith.mulf %332, %330 : vector<2x32xf32>
    %334 = arith.mulf %324, %293 : vector<2x32xf32>
    %335 = arith.addf %333, %334 : vector<2x32xf32>
    %336 = arith.index_cast %c7_i32 : i32 to index
    %c0_134 = arith.constant 0 : index
    %c0_135 = arith.constant 0 : index
    %337 = vector.load %arg2[%336, %c0_134, %c0_135] : memref<8x2x32xf32, #tpu.memory_space<vmem>>, vector<1x2x32xf32>
    %338 = vector.shape_cast %337 : vector<1x2x32xf32> to vector<2x32xf32>
    %339 = arith.mulf %338, %335 : vector<2x32xf32>
    %340 = arith.index_cast %c7_i32 : i32 to index
    %c0_136 = arith.constant 0 : index
    %c0_137 = arith.constant 0 : index
    %341 = vector.load %arg10[%340, %c0_136, %c0_137] : memref<8x2x32xf32, #tpu.memory_space<vmem>>, vector<1x2x32xf32>
    %342 = vector.shape_cast %341 : vector<1x2x32xf32> to vector<2x32xf32>
    %343 = vector.shape_cast %339 : vector<2x32xf32> to vector<1x2x32xf32>
    tpu.vector_store %arg10[%340, %c0_136, %c0_137], %343 {strides = array<i32>} : memref<8x2x32xf32, #tpu.memory_space<vmem>>, vector<1x2x32xf32>,
    %c8_i32 = arith.constant 8 : i32
    %c0_138 = arith.constant 0 : index
    %c0_139 = arith.constant 0 : index
    %344 = vector.load %arg11[%c0_138, %c0_139] : memref<2x32xf32, #tpu.memory_space<vmem>>, vector<2x32xf32>
    tpu.vector_store %arg11[%c0_138, %c0_139], %335 {strides = array<i32>} : memref<2x32xf32, #tpu.memory_space<vmem>>, vector<2x32xf32>,
    return
  }
  func.func @transform_0(%arg0: i32, %arg1: i32) -> (i32, i32, i32) {
    %c0_i32 = arith.constant 0 : i32
    %c0_i32_0 = arith.constant 0 : i32
    return %arg1, %arg0, %c0_i32 : i32, i32, i32
  }
  func.func @transform_1(%arg0: i32, %arg1: i32) -> (i32, i32, i32) {
    %c0_i32 = arith.constant 0 : i32
    %c0_i32_0 = arith.constant 0 : i32
    return %arg1, %arg0, %c0_i32 : i32, i32, i32
  }
  func.func @transform_2(%arg0: i32, %arg1: i32) -> (i32, i32, i32) {
    %c0_i32 = arith.constant 0 : i32
    %c0_i32_0 = arith.constant 0 : i32
    return %arg1, %arg0, %c0_i32 : i32, i32, i32
  }
  func.func @transform_3(%arg0: i32, %arg1: i32) -> (i32, i32, i32) {
    %c0_i32 = arith.constant 0 : i32
    %c0_i32_0 = arith.constant 0 : i32
    return %arg1, %arg0, %c0_i32 : i32, i32, i32
  }
  func.func @transform_4(%arg0: i32, %arg1: i32) -> (i32, i32) {
    %c0_i32 = arith.constant 0 : i32
    %c0_i32_0 = arith.constant 0 : i32
    %c0_i32_1 = arith.constant 0 : i32
    return %c0_i32, %c0_i32_0 : i32, i32
  }
  func.func @transform_5(%arg0: i32, %arg1: i32) -> (i32, i32) {
    %c0_i32 = arith.constant 0 : i32
    %c0_i32_0 = arith.constant 0 : i32
    %c0_i32_1 = arith.constant 0 : i32
    return %c0_i32, %c0_i32_0 : i32, i32
  }
  func.func @transform_6(%arg0: i32, %arg1: i32) -> (i32, i32) {
    %c0_i32 = arith.constant 0 : i32
    %c0_i32_0 = arith.constant 0 : i32
    %c0_i32_1 = arith.constant 0 : i32
    return %c0_i32, %c0_i32_0 : i32, i32
  }
  func.func @transform_7(%arg0: i32, %arg1: i32) -> (i32, i32) {
    %c0_i32 = arith.constant 0 : i32
    %c0_i32_0 = arith.constant 0 : i32
    %c0_i32_1 = arith.constant 0 : i32
    return %c0_i32, %c0_i32_0 : i32, i32
  }
  func.func @transform_8(%arg0: i32, %arg1: i32) -> (i32, i32, i32) {
    %c0_i32 = arith.constant 0 : i32
    %c0_i32_0 = arith.constant 0 : i32
    return %arg1, %arg0, %c0_i32 : i32, i32, i32
  }
}

</mosaic_0001>

<bundles_post_ra>
// kernel: graffin_forward.2
= control target key start
LH: loop header
LB: loop body
LE: loop exit
PB: predicated region body
PF: predicated region fallthrough
CT: control target
= control target key end

     0   :  { %vm47_vm0 = vcmask 130048   ;;  %vm139_vm1 = vcmask 261120   ;;  %s639_s1 = inlined_call_operand.vmem [shape: f32[16,32], index: 1, kind: input, shape index: {}]   ;;  %s640_s0 = inlined_call_operand.vmem [shape: f32[16,16], index: 0, kind: input, shape index: {}]   ;;  %s641_s3 = inlined_call_operand.vmem [shape: f32[16,32], index: 3, kind: input, shape index: {}]   ;;  %s642_s4 = inlined_call_operand.vmem [shape: f32[16,32], index: 4, kind: input, shape index: {}]   ;;  %s643_s5 = inlined_call_operand.vmem [shape: f32[16,32], index: 5, kind: input, shape index: {}]   ;;  %s644_s2 = inlined_call_operand.vmem [shape: f32[1,32], index: 2, kind: input, shape index: {}]   ;;  %s645_s6 = inlined_call_operand.vmem [shape: f32[1,32], index: 6, kind: input, shape index: {}]   ;;  %s646_s7 = inlined_call_operand.vmem [shape: f32[1,32], index: 7, kind: input, shape index: {}]   ;;  %s647_s8 = inlined_call_operand.vmem [shape: f32[1,32], index: 8, kind: input, shape index: {}]   ;;  %s648_s10 = inlined_call_operand.vmem [shape: f32[16,32], index: 10, kind: output, shape index: {1}]   ;;  %s649_s11 = inlined_call_operand.vmem [shape: f32[16,32], index: 11, kind: output, shape index: {2}]   ;;  %s650_s12 = inlined_call_operand.vmem [shape: f32[16,32], index: 12, kind: output, shape index: {3}]   ;;  %s651_s9 = inlined_call_operand.vmem [shape: f32[16,32], index: 9, kind: output, shape index: {0}]  }
   0x1   :  { %v38_v0 = vld [vmem:[%s639_s1] sm:$0xff]  ;;  %v39_v1 = vld [vmem:[%s639_s1 + $0x8] sm:$0xff] }
   0x2   :  { %v36_v2 = vld [vmem:[%s640_s0] sm:$0xff]  ;;  %v472_v3 = vpack.c.bf16 %v39_v1, %v38_v0  ;;  %v143_v5 = vld [vmem:[%s641_s3 + $0x8] sm:$0xff] }
   0x3   :  { %448 = vmatprep.mubr.msk.f32.mxu0 %vm47_vm0, %v36_v2  ;;  %v142_v4 = vld [vmem:[%s641_s3] sm:$0xff]  ;;  %455 = vmatprep.mubr.msk.f32.mxu1 %vm47_vm0, %v36_v2  ;;  %v229_v8 = vld [vmem:[%s642_s4 + $0x8] sm:$0xff] }
   0x4   :  { %v476_v6 = vpack.c.bf16 %v143_v5, %v142_v4  ;;  %v228_v7 = vld [vmem:[%s642_s4] sm:$0xff]  ;;  %473 = vmatprep.subr.bf16.mxu0 %v472_v3  ;;  %v315_v11 = vld [vmem:[%s643_s5 + $0x8] sm:$0xff] }
   0x5   :  { %v314_v9 = vld [vmem:[%s643_s5] sm:$0xff]  ;;  %v480_v10 = vpack.c.bf16 %v229_v8, %v228_v7  ;;  %475 = vmatpush3.bf16.msra.mxu0 %v472_v3  ;;  %v37_v12 = vld [vmem:[%s640_s0 + $0x8] sm:$0xff] }
   0x6   :  { %477 = vmatprep.subr.bf16.mxu1 %v476_v6  ;;  %v484_v13 = vpack.c.bf16 %v315_v11, %v314_v9  ;;  %v416_v14 = vld [vmem:[%s644_s2] ss:$0 sm:$0xff] }
   0x7   :  { %479 = vmatpush3.bf16.msra.mxu1 %v476_v6  ;;  %481 = vmatprep.subr.bf16.mxu0 %v480_v10  ;;  %v419_v15 = vld [vmem:[%s645_s6] ss:$0 sm:$0xff] }
   0x8   :  { %485 = vmatprep.subr.bf16.mxu1 %v484_v13  ;;  %449 = vmatmul.mubr.msk.f32.vlgmr.msra.gmra.mrb[0].mxu0 %vm47_vm0, %v37_v12  ;;  %v422_v23 = vld [vmem:[%s646_s7] ss:$0 sm:$0xff] }
   0x9   :  { %483 = vmatpush3.bf16.msra.mxu0 %v480_v10  ;;  %462 = vmatprep.mubr.msk.f32.mxu0 %vm47_vm0, %v36_v2  ;;  %v425_v26 = vld [vmem:[%s647_s8] ss:$0 sm:$0xff] }
   0xa   :  { %456 = vmatmul.mubr.msk.f32.vlgmr.msra.gmra.mrb[0].mxu1 %vm47_vm0, %v37_v12 }
   0xb   :  { %487 = vmatpush3.bf16.msra.mxu1 %v484_v13  ;;  %469 = vmatprep.mubr.msk.f32.mxu1 %vm47_vm0, %v36_v2 }
   0xc   :  { %463 = vmatmul.mubr.msk.f32.vlgmr.msra.gmra.mrb[2].mxu0 %vm47_vm0, %v37_v12 }
   0xe   :  { %470 = vmatmul.mubr.msk.f32.vlgmr.msra.gmra.mrb[2].mxu1 %vm47_vm0, %v37_v12 }
  0xdb   :  { %v450_v16 = vpop.f32.mrb[0].mxu0 }
  0xdc   :  { %v126_v17 = vadd.f32 %v450_v16, %v416_v14  ;;  %v120_v18 = vpop.f32.mrb[1].mxu0 }
  0xdd   :  { %v457_v19 = vpop.f32.mrb[0].mxu1  ;;  %v121_v20 = vadd.f32 %v416_v14, %v120_v18 }
  0xde   :  { %v223_v21 = vadd.f32 %v457_v19, %v419_v15  ;;  %v217_v22 = vpop.f32.mrb[1].mxu1  ;;  %v132_v24 = vmul.f32 0.70710677, %v126_v17  ;;  %v130_v38 = vmul.f32 0.5, %v126_v17 }
  0xdf   :  { %v218_v25 = vadd.f32 %v419_v15, %v217_v22  ;;  %v131_v27 = vmul.f32 0.70710677, %v121_v20  ;;  %v464_v28 = vpop.f32.mrb[2].mxu0  ;;  %v129_v40 = vmul.f32 0.5, %v121_v20 }
  0xe0   :  { %227 = vst.msk [vmem:[%s648_s10 + $0x8] sm:$0xff] %vm139_vm1, %v223_v21  ;;  %488 = verf.f32 %v132_v24  ;;  %v309_v29 = vadd.f32 %v464_v28, %v422_v23  ;;  %v303_v31 = vpop.f32.mrb[3].mxu0 }
  0xe1   :  { %226 = vst.msk [vmem:[%s648_s10] sm:$0xff] %vm139_vm1, %v218_v25  ;;  %v471_v30 = vpop.f32.mrb[2].mxu1  ;;  %490 = verf.f32 %v131_v27  ;;  %v304_v33 = vadd.f32 %v422_v23, %v303_v31 }
  0xe2   :  { %v395_v32 = vadd.f32 %v471_v30, %v425_v26  ;;  %v389_v34 = vpop.f32.mrb[3].mxu1  ;;  %313 = vst.msk [vmem:[%s649_s11 + $0x8] sm:$0xff] %vm139_vm1, %v309_v29 }
  0xe3   :  { %v390_v35 = vadd.f32 %v425_v26, %v389_v34  ;;  %312 = vst.msk [vmem:[%s649_s11] sm:$0xff] %vm139_vm1, %v304_v33 }
  0xe4   :  { %399 = vst.msk [vmem:[%s650_s12 + $0x8] sm:$0xff] %vm139_vm1, %v395_v32 }
  0xe5   :  { %398 = vst.msk [vmem:[%s650_s12] sm:$0xff] %vm139_vm1, %v390_v35 }
  0xea   :  { %v489_v36 = vpop.eup %488 }
  0xeb   :  { %v491_v37 = vpop.eup %490  ;;  %v136_v39 = vadd.f32 1.0, %v489_v36 }
  0xec   :  { %v135_v41 = vadd.f32 1.0, %v491_v37 }
  0xed   :  { %v138_v42 = vmul.f32 %v136_v39, %v130_v38 }
  0xee   :  { %v137_v43 = vmul.f32 %v135_v41, %v129_v40 }
  0xef   :  { %141 = vst.msk [vmem:[%s651_s9 + $0x8] sm:$0xff] %vm139_vm1, %v138_v42 }
  0xf0   :  { %140 = vst.msk [vmem:[%s651_s9] sm:$0xff] %vm139_vm1, %v137_v43 }

// kernel: graffin_forward.3
= control target key start
LH: loop header
LB: loop body
LE: loop exit
PB: predicated region body
PF: predicated region fallthrough
CT: control target
= control target key end

     0   :  { %v2737_v3 = vmov 0.0|0.0   ;;  %vm2738_vm0 = vmmov 0   ;;  %v2739_v6 = vmov 0.0   ;;  %vm34_vm1 = vcmask 254976   ;;  %s3136_s0 = inlined_call_operand.vmem [shape: f32[8,2,32], index: 0, kind: input, shape index: {}]   ;;  %s3137_s1 = inlined_call_operand.vmem [shape: f32[8,2,32], index: 1, kind: input, shape index: {}]   ;;  %s3138_s2 = inlined_call_operand.vmem [shape: f32[8,2,32], index: 2, kind: input, shape index: {}]   ;;  %s3139_s3 = inlined_call_operand.vmem [shape: f32[8,2,32], index: 3, kind: input, shape index: {}]   ;;  %s3140_s4 = inlined_call_operand.vmem [shape: f32[32,32], index: 4, kind: input, shape index: {}]   ;;  %s3141_s5 = inlined_call_operand.vmem [shape: f32[32,32], index: 5, kind: input, shape index: {}]   ;;  %s3142_s6 = inlined_call_operand.vmem [shape: f32[32,32], index: 6, kind: input, shape index: {}]   ;;  %s3143_s7 = inlined_call_operand.vmem [shape: f32[1,32], index: 7, kind: input, shape index: {}]   ;;  %s3144_s8 = inlined_call_operand.hbm [shape: f32[8,2,32], index: 8, kind: output, shape index: {}]  }
   0x1   :  { %v36_v0 = vld [vmem:[%s3140_s4] sm:$0xff]  ;;  %v37_v1 = vld [vmem:[%s3140_s4 + $0x8] sm:$0xff]  ;;  %v38_v2 = vld [vmem:[%s3140_s4 + $0x10] sm:$0xff]  ;;  %2483 = vmatprep.subr.bf16.mxu0 %v2737_v3  ;;  %2227 = vmatprep.mubr.msk.f32.mxu0 %vm2738_vm0, %v2739_v6  ;;  %35 = vst.msk [vmem:[#allocation2] sm:$0x3] %vm34_vm1, %v2739_v6 }
   0x2   :  { %v2798_v4 = vpack.c.bf16 %v37_v1, %v36_v0  ;;  %v39_v5 = vld [vmem:[%s3140_s4 + $0x18] sm:$0xff]  ;;  %v40_v7 = vld [vmem:[%s3141_s5] sm:$0xff]  ;;  %v41_v8 = vld [vmem:[%s3141_s5 + $0x8] sm:$0xff]  ;;  %2489 = vmatprep.subr.bf16.mxu1 %v2737_v3  ;;  %2238 = vmatprep.mubr.msk.f32.mxu1 %vm2738_vm0, %v2739_v6 }
   0x3   :  { %v2814_v9 = vpack.c.bf16 %v41_v8, %v40_v7  ;;  %v42_v10 = vld [vmem:[%s3141_s5 + $0x10] sm:$0xff]  ;;  %v43_v11 = vld [vmem:[%s3141_s5 + $0x18] sm:$0xff]  ;;  %v2825_v12 = vpack.c.bf16 %v39_v5, %v38_v2  ;;  %v44_v14 = vld [vmem:[%s3142_s6] sm:$0xff] }
   0x4   :  { %2485 = vmatpush3.bf16.msra.mxu0 %v2798_v4  ;;  %v2829_v13 = vpack.c.bf16 %v43_v11, %v42_v10  ;;  %v45_v15 = vld [vmem:[%s3142_s6 + $0x8] sm:$0xff] }
   0x5   :  { %2486 = vmatprep.subr.bf16.mxu0 %v2737_v3  ;;  %2491 = vmatpush3.bf16.msra.mxu1 %v2814_v9 }
   0x6   :  { %13 = vsyncpa [#allocation4], 0  ;;  %2492 = vmatprep.subr.bf16.mxu1 %v2737_v3  ;;  %vm50_vm2 = vcmask 261120   ;;  %v2839_v16 = vpack.c.bf16 %v45_v15, %v44_v14  ;;  %v46_v17 = vld [vmem:[%s3142_s6 + $0x10] sm:$0xff]  ;;  %v47_v18 = vld [vmem:[%s3142_s6 + $0x18] sm:$0xff]  ;;  %s2740_s15 = smov [#allocation3]  }
   0x7   :  { %v2853_v20 = vpack.c.bf16 %v47_v18, %v46_v17  ;;  %v270_v21 = vld [vmem:[%s3137_s1] sm:$0x3]  ;;  %v2039_v51 = vld [vmem:[%s3137_s1 + $0x2] sm:$0x3]  ;;  %s2019_s16 = sshll.u32 %s2740_s15, 4  ;;  %s2020_s16 = int_to_ptr.vmem [resolvable:$true] %s2019_s16 }
   0x8   :  { %2488 = vmatpush3.bf16.msra.mxu0 %v2825_v12  ;;  %v49_v19 = vld [vmem:[#allocation2] sm:$0x3]  ;;  %v2041_v55 = vld [vmem:[%s3138_s2 + $0x2] sm:$0x3]  ;;  %p2718_p1 = scmp.lt.s32.totalorder %s2020_s16, %s2020_s16 }
   0x9   :  { %2494 = vmatpush3.bf16.msra.mxu1 %v2829_v13  ;;  %2495 = vmatprep.subr.bf16.mxu0 %v2737_v3  ;;  %v278_v22 = vld [vmem:[%s3138_s2] sm:$0x3]  ;;  %v2043_v8 = vld [vmem:[%s3139_s3 + $0x2] sm:$0x3] }
   0xa   :  { %2501 = vmatprep.subr.bf16.mxu1 %v2737_v3  ;;  %v2882_v36 = vld [vmem:[%s3143_s7] ss:$0 sm:$0xff] }
   0xb   :  { %2228 = vmatmul.mubr.msk.f32.vlgmr.msra.gmra.mrb[0].mxu0 %vm50_vm2, %v49_v19  ;;  %v286_v40 = vld [vmem:[%s3139_s3] sm:$0x3] }
   0xc   :  { %2239 = vmatmul.mubr.msk.f32.vlgmr.msra.gmra.mrb[0].mxu1 %vm50_vm2, %v49_v19  ;;  %2497 = vmatpush3.bf16.msra.mxu0 %v2839_v16  ;;  %v294_v48 = vld [vmem:[%s3136_s0] sm:$0x3] }
   0xd   :  { %2498 = vmatprep.subr.bf16.mxu0 %v2737_v3  ;;  %2249 = vmatprep.mubr.msk.f32.mxu0 %vm2738_vm0, %v2739_v6 }
   0xe   :  { %2503 = vmatpush3.bf16.msra.mxu1 %v2798_v4  ;;  %2260 = vmatprep.mubr.msk.f32.mxu1 %vm2738_vm0, %v2739_v6 }
   0xf   :  { %2504 = vmatprep.subr.bf16.mxu1 %v2737_v3 }
  0x10   :  { %2500 = vmatpush3.bf16.msra.mxu0 %v2853_v20 }
  0x11   :  { %2507 = vmatprep.subr.bf16.mxu0 %v2737_v3 }
  0x12   :  { %2506 = vmatpush3.bf16.msra.mxu1 %v2825_v12 }
  0x13   :  { %2250 = vmatmul.mubr.msk.f32.vlgmr.msra.gmra.mrb[2].mxu0 %vm50_vm2, %v49_v19  ;;  %2513 = vmatprep.subr.bf16.mxu1 %v2737_v3 }
  0x14   :  { %2509 = vmatpush3.bf16.msra.mxu0 %v2814_v9  ;;  %2271 = vmatprep.mubr.msk.f32.mxu0 %vm2738_vm0, %v2739_v6 }
  0x15   :  { %2510 = vmatprep.subr.bf16.mxu0 %v2737_v3 }
  0x18   :  { %2512 = vmatpush3.bf16.msra.mxu0 %v2829_v13 }
  0x19   :  { %2519 = vmatprep.subr.bf16.mxu0 %v2737_v3 }
  0xde   :  { %v120_v23 = vpop.f32.mrb[0].mxu0 }
  0xdf   :  { %v271_v24 = vadd.f32 %v270_v21, %v120_v23  ;;  %v2229_v25 = vpop.f32.mrb[1].mxu0  ;;  %v190_v26 = vpop.f32.mrb[0].mxu1  ;;  %v2044_v21 = vld [vmem:[%s3136_s0 + $0x2] sm:$0x3] }
  0xe0   :  { %v279_v27 = vadd.f32 %v278_v22, %v190_v26  ;;  %v2240_v28 = vpop.f32.mrb[1].mxu1 }
  0xe1   :  { %v2034_v29 = vmul.f32 -1.442695, %v271_v24  ;;  %v2048_v24 = vld [vmem:[%s3137_s1 + $0x4] sm:$0x3] }
  0xe2   :  { %v2035_v30 = vmul.f32 -1.442695, %v279_v27  ;;  %v2050_v28 = vld [vmem:[%s3138_s2 + $0x4] sm:$0x3] }
  0xe3   :  { %2633 = vpow2.f32 %v2034_v29 }
  0xe4   :  { %2635 = vpow2.f32 %v2035_v30 }
  0xe6   :  { %v266_v31 = vpop.f32.mrb[2].mxu0 }
  0xe7   :  { %v2251_v32 = vpop.f32.mrb[3].mxu0  ;;  %v267_v38 = vadd.f32 %v2882_v36, %v266_v31 }
  0xed   :  { %v2634_v33 = vpop.eup %2633 }
  0xee   :  { %v275_v34 = vadd.f32 1.0, %v2634_v33  ;;  %v2636_v35 = vpop.eup %2635 }
  0xef   :  { %v283_v37 = vadd.f32 1.0, %v2636_v35 }
  0xf0   :  { %2637 = vrcp.f32 %v275_v34 }
  0xf1   :  { %2639 = vrcp.f32 %v283_v37 }
  0xfa   :  { %v2638_v39 = vpop.eup %2637 }
  0xfb   :  { %v287_v41 = vmul.f32 %v2638_v39, %v267_v38  ;;  %v2640_v43 = vpop.eup %2639 }
  0xfc   :  { %v290_v44 = vsub.f32 1.0, %v2640_v43  ;;  %v292_v47 = vmul.f32 %v2640_v43, %v49_v19  ;;  %v2052_v43 = vld [vmem:[%s3139_s3 + $0x4] sm:$0x3] }
  0xfd   :  { %v288_v42 = vadd.f32 %v287_v41, %v286_v40 }
  0xff   :  { %2641 = vtanh.f32 %v288_v42 }
 0x109   :  { %v2642_v45 = vpop.eup %2641 }
 0x10a   :  { %v291_v46 = vmul.f32 %v2642_v45, %v290_v44 }
 0x10c   :  { %v293_v49 = vadd.f32 %v292_v47, %v291_v46 }
 0x10e   :  { %v295_v50 = vmul.f32 %v294_v48, %v293_v49  ;;  %2261 = vmatmul.mubr.msk.f32.vlgmr.msra.gmra.mrb[2].mxu1 %vm50_vm2, %v293_v49  ;;  %2272 = vmatmul.mubr.msk.f32.vlgmr.msra.gmra.mrb[4].mxu0 %vm50_vm2, %v293_v49 }
 0x10f   :  { %2515 = vmatpush3.bf16.msra.mxu1 %v2839_v16  ;;  %2282 = vmatprep.mubr.msk.f32.mxu1 %vm2738_vm0, %v2739_v6 }
 0x110   :  { %297 = vst.msk [vmem:[#allocation3] sm:$0x3] %vm34_vm1, %v295_v50  ;;  %2516 = vmatprep.subr.bf16.mxu1 %v2737_v3  ;;  %2521 = vmatpush3.bf16.msra.mxu0 %v2798_v4 }
 0x111   :  { %2522 = vmatprep.subr.bf16.mxu0 %v2737_v3  ;;  %2293 = vmatprep.mubr.msk.f32.mxu0 %vm2738_vm0, %v2739_v6 }
 0x113   :  { %2518 = vmatpush3.bf16.msra.mxu1 %v2853_v20 }
 0x114   :  { %2525 = vmatprep.subr.bf16.mxu1 %v2737_v3  ;;  %2524 = vmatpush3.bf16.msra.mxu0 %v2825_v12 }
 0x115   :  { %2531 = vmatprep.subr.bf16.mxu0 %v2737_v3 }
 0x116   :  { %2283 = vmatmul.mubr.msk.f32.vlgmr.msra.gmra.mrb[4].mxu1 %vm50_vm2, %v293_v49 }
 0x117   :  { %2527 = vmatpush3.bf16.msra.mxu1 %v2814_v9  ;;  %2304 = vmatprep.mubr.msk.f32.mxu1 %vm2738_vm0, %v2739_v6 }
 0x118   :  { %2528 = vmatprep.subr.bf16.mxu1 %v2737_v3 }
 0x11b   :  { %2530 = vmatpush3.bf16.msra.mxu1 %v2829_v13 }
 0x11c   :  { %2537 = vmatprep.subr.bf16.mxu1 %v2737_v3 }
 0x1e1   :  { %v367_v52 = vpop.f32.mrb[2].mxu1  ;;  %v437_v53 = vpop.f32.mrb[4].mxu0 }
 0x1e2   :  { %v513_v54 = vadd.f32 %v2039_v51, %v367_v52  ;;  %v2262_v56 = vpop.f32.mrb[3].mxu1  ;;  %v2273_v57 = vpop.f32.mrb[5].mxu0  ;;  %v522_v59 = vadd.f32 %v2041_v55, %v437_v53  ;;  %v2053_v51 = vld [vmem:[%s3136_s0 + $0x4] sm:$0x3] }
 0x1e4   :  { %v2040_v58 = vmul.f32 -1.442695, %v513_v54  ;;  %v2042_v60 = vmul.f32 -1.442695, %v522_v59  ;;  %v2057_v54 = vld [vmem:[%s3137_s1 + $0x6] sm:$0x3] }
 0x1e6   :  { %2643 = vpow2.f32 %v2040_v58  ;;  %v2059_v58 = vld [vmem:[%s3138_s2 + $0x6] sm:$0x3] }
 0x1e7   :  { %2645 = vpow2.f32 %v2042_v60 }
 0x1e9   :  { %v507_v61 = vpop.f32.mrb[4].mxu1 }
 0x1ea   :  { %v2284_v62 = vpop.f32.mrb[5].mxu1  ;;  %v508_v5 = vadd.f32 %v2882_v36, %v507_v61 }
 0x1f0   :  { %v2644_v63 = vpop.eup %2643 }
 0x1f1   :  { %v517_v0 = vadd.f32 1.0, %v2644_v63  ;;  %v2646_v1 = vpop.eup %2645 }
 0x1f2   :  { %v526_v2 = vadd.f32 1.0, %v2646_v1 }
 0x1f3   :  { %2647 = vrcp.f32 %v517_v0 }
 0x1f4   :  { %2649 = vrcp.f32 %v526_v2 }
 0x1fd   :  { %v2648_v7 = vpop.eup %2647 }
 0x1fe   :  { %v531_v10 = vmul.f32 %v2648_v7, %v508_v5  ;;  %v2650_v14 = vpop.eup %2649 }
 0x1ff   :  { %v534_v15 = vsub.f32 1.0, %v2650_v14  ;;  %v536_v19 = vmul.f32 %v2650_v14, %v293_v49  ;;  %v2061_v14 = vld [vmem:[%s3139_s3 + $0x6] sm:$0x3] }
 0x200   :  { %v532_v11 = vadd.f32 %v2043_v8, %v531_v10 }
 0x202   :  { %2651 = vtanh.f32 %v532_v11 }
 0x20c   :  { %v2652_v17 = vpop.eup %2651 }
 0x20d   :  { %v535_v18 = vmul.f32 %v2652_v17, %v534_v15 }
 0x20f   :  { %v537_v22 = vadd.f32 %v536_v19, %v535_v18 }
 0x211   :  { %v540_v23 = vmul.f32 %v2044_v21, %v537_v22  ;;  %2294 = vmatmul.mubr.msk.f32.vlgmr.msra.gmra.mrb[6].mxu0 %vm50_vm2, %v537_v22  ;;  %2305 = vmatmul.mubr.msk.f32.vlgmr.msra.gmra.mrb[6].mxu1 %vm50_vm2, %v537_v22 }
 0x212   :  { %2533 = vmatpush3.bf16.msra.mxu0 %v2839_v16  ;;  %2315 = vmatprep.mubr.msk.f32.mxu0 %vm2738_vm0, %v2739_v6 }
 0x213   :  { %542 = vst.msk [vmem:[#allocation3 + $0x2] sm:$0x3] %vm34_vm1, %v540_v23  ;;  %2534 = vmatprep.subr.bf16.mxu0 %v2737_v3  ;;  %2539 = vmatpush3.bf16.msra.mxu1 %v2798_v4 }
 0x214   :  { %2540 = vmatprep.subr.bf16.mxu1 %v2737_v3  ;;  %2326 = vmatprep.mubr.msk.f32.mxu1 %vm2738_vm0, %v2739_v6 }
 0x216   :  { %2536 = vmatpush3.bf16.msra.mxu0 %v2853_v20 }
 0x217   :  { %2543 = vmatprep.subr.bf16.mxu0 %v2737_v3  ;;  %2542 = vmatpush3.bf16.msra.mxu1 %v2825_v12 }
 0x218   :  { %2549 = vmatprep.subr.bf16.mxu1 %v2737_v3 }
 0x219   :  { %2316 = vmatmul.mubr.msk.f32.vlgmr.msra.gmra.mrb[8].mxu0 %vm50_vm2, %v537_v22 }
 0x21a   :  { %2545 = vmatpush3.bf16.msra.mxu0 %v2814_v9  ;;  %2337 = vmatprep.mubr.msk.f32.mxu0 %vm2738_vm0, %v2739_v6 }
 0x21b   :  { %2546 = vmatprep.subr.bf16.mxu0 %v2737_v3 }
 0x21e   :  { %2548 = vmatpush3.bf16.msra.mxu0 %v2829_v13 }
 0x21f   :  { %2555 = vmatprep.subr.bf16.mxu0 %v2737_v3 }
 0x2e4   :  { %v612_v25 = vpop.f32.mrb[6].mxu0  ;;  %v682_v26 = vpop.f32.mrb[6].mxu1 }
 0x2e5   :  { %v758_v27 = vadd.f32 %v2048_v24, %v612_v25  ;;  %v2295_v29 = vpop.f32.mrb[7].mxu0  ;;  %v2306_v30 = vpop.f32.mrb[7].mxu1  ;;  %v767_v32 = vadd.f32 %v2050_v28, %v682_v26  ;;  %v2062_v24 = vld [vmem:[%s3136_s0 + $0x6] sm:$0x3] }
 0x2e7   :  { %v2049_v31 = vmul.f32 -1.442695, %v758_v27  ;;  %v2051_v33 = vmul.f32 -1.442695, %v767_v32  ;;  %v2066_v27 = vld [vmem:[%s3137_s1 + $0x8] sm:$0x3] }
 0x2e9   :  { %2653 = vpow2.f32 %v2049_v31  ;;  %v2068_v31 = vld [vmem:[%s3138_s2 + $0x8] sm:$0x3] }
 0x2ea   :  { %2655 = vpow2.f32 %v2051_v33 }
 0x2ec   :  { %v752_v34 = vpop.f32.mrb[8].mxu0 }
 0x2ed   :  { %v2317_v35 = vpop.f32.mrb[9].mxu0  ;;  %v753_v41 = vadd.f32 %v2882_v36, %v752_v34 }
 0x2f3   :  { %v2654_v37 = vpop.eup %2653 }
 0x2f4   :  { %v762_v38 = vadd.f32 1.0, %v2654_v37  ;;  %v2656_v39 = vpop.eup %2655 }
 0x2f5   :  { %v771_v40 = vadd.f32 1.0, %v2656_v39 }
 0x2f6   :  { %2657 = vrcp.f32 %v762_v38 }
 0x2f7   :  { %2659 = vrcp.f32 %v771_v40 }
 0x300   :  { %v2658_v42 = vpop.eup %2657 }
 0x301   :  { %v776_v44 = vmul.f32 %v2658_v42, %v753_v41  ;;  %v2660_v46 = vpop.eup %2659 }
 0x302   :  { %v779_v47 = vsub.f32 1.0, %v2660_v46  ;;  %v781_v50 = vmul.f32 %v2660_v46, %v537_v22  ;;  %v2070_v46 = vld [vmem:[%s3139_s3 + $0x8] sm:$0x3] }
 0x303   :  { %v777_v45 = vadd.f32 %v2052_v43, %v776_v44 }
 0x305   :  { %2661 = vtanh.f32 %v777_v45 }
 0x30f   :  { %v2662_v48 = vpop.eup %2661 }
 0x310   :  { %v780_v49 = vmul.f32 %v2662_v48, %v779_v47 }
 0x312   :  { %v782_v52 = vadd.f32 %v781_v50, %v780_v49 }
 0x314   :  { %v785_v53 = vmul.f32 %v2053_v51, %v782_v52  ;;  %2327 = vmatmul.mubr.msk.f32.vlgmr.msra.gmra.mrb[8].mxu1 %vm50_vm2, %v782_v52  ;;  %2338 = vmatmul.mubr.msk.f32.vlgmr.msra.gmra.mrb[10].mxu0 %vm50_vm2, %v782_v52 }
 0x315   :  { %2551 = vmatpush3.bf16.msra.mxu1 %v2839_v16  ;;  %2348 = vmatprep.mubr.msk.f32.mxu1 %vm2738_vm0, %v2739_v6 }
 0x316   :  { %787 = vst.msk [vmem:[#allocation3 + $0x4] sm:$0x3] %vm34_vm1, %v785_v53  ;;  %2552 = vmatprep.subr.bf16.mxu1 %v2737_v3  ;;  %2557 = vmatpush3.bf16.msra.mxu0 %v2798_v4 }
 0x317   :  { %2558 = vmatprep.subr.bf16.mxu0 %v2737_v3  ;;  %2359 = vmatprep.mubr.msk.f32.mxu0 %vm2738_vm0, %v2739_v6 }
 0x319   :  { %2554 = vmatpush3.bf16.msra.mxu1 %v2853_v20 }
 0x31a   :  { %2561 = vmatprep.subr.bf16.mxu1 %v2737_v3  ;;  %2560 = vmatpush3.bf16.msra.mxu0 %v2825_v12 }
 0x31b   :  { %2567 = vmatprep.subr.bf16.mxu0 %v2737_v3 }
 0x31c   :  { %2349 = vmatmul.mubr.msk.f32.vlgmr.msra.gmra.mrb[10].mxu1 %vm50_vm2, %v782_v52 }
 0x31d   :  { %2563 = vmatpush3.bf16.msra.mxu1 %v2814_v9  ;;  %2370 = vmatprep.mubr.msk.f32.mxu1 %vm2738_vm0, %v2739_v6 }
 0x31e   :  { %2564 = vmatprep.subr.bf16.mxu1 %v2737_v3 }
 0x321   :  { %2566 = vmatpush3.bf16.msra.mxu1 %v2829_v13 }
 0x322   :  { %2573 = vmatprep.subr.bf16.mxu1 %v2737_v3 }
 0x3e7   :  { %v857_v55 = vpop.f32.mrb[8].mxu1  ;;  %v927_v56 = vpop.f32.mrb[10].mxu0 }
 0x3e8   :  { %v1003_v57 = vadd.f32 %v2057_v54, %v857_v55  ;;  %v2328_v59 = vpop.f32.mrb[9].mxu1  ;;  %v2339_v60 = vpop.f32.mrb[11].mxu0  ;;  %v1012_v62 = vadd.f32 %v2059_v58, %v927_v56  ;;  %v2071_v54 = vld [vmem:[%s3136_s0 + $0x8] sm:$0x3] }
 0x3ea   :  { %v2058_v61 = vmul.f32 -1.442695, %v1003_v57  ;;  %v2060_v63 = vmul.f32 -1.442695, %v1012_v62  ;;  %v2075_v57 = vld [vmem:[%s3137_s1 + $0xa] sm:$0x3] }
 0x3ec   :  { %2663 = vpow2.f32 %v2058_v61  ;;  %v2077_v61 = vld [vmem:[%s3138_s2 + $0xa] sm:$0x3] }
 0x3ed   :  { %2665 = vpow2.f32 %v2060_v63 }
 0x3ef   :  { %v997_v0 = vpop.f32.mrb[10].mxu1 }
 0x3f0   :  { %v2350_v1 = vpop.f32.mrb[11].mxu1  ;;  %v998_v10 = vadd.f32 %v2882_v36, %v997_v0 }
 0x3f6   :  { %v2664_v2 = vpop.eup %2663 }
 0x3f7   :  { %v1007_v5 = vadd.f32 1.0, %v2664_v2  ;;  %v2666_v7 = vpop.eup %2665 }
 0x3f8   :  { %v1016_v8 = vadd.f32 1.0, %v2666_v7 }
 0x3f9   :  { %2667 = vrcp.f32 %v1007_v5 }
 0x3fa   :  { %2669 = vrcp.f32 %v1016_v8 }
 0x403   :  { %v2668_v11 = vpop.eup %2667 }
 0x404   :  { %v1021_v15 = vmul.f32 %v2668_v11, %v998_v10  ;;  %v2670_v18 = vpop.eup %2669 }
 0x405   :  { %v1024_v19 = vsub.f32 1.0, %v2670_v18  ;;  %v1026_v23 = vmul.f32 %v2670_v18, %v782_v52  ;;  %v2079_v18 = vld [vmem:[%s3139_s3 + $0xa] sm:$0x3] }
 0x406   :  { %v1022_v17 = vadd.f32 %v2061_v14, %v1021_v15 }
 0x408   :  { %2671 = vtanh.f32 %v1022_v17 }
 0x412   :  { %v2672_v21 = vpop.eup %2671 }
 0x413   :  { %v1025_v22 = vmul.f32 %v2672_v21, %v1024_v19 }
 0x415   :  { %v1027_v25 = vadd.f32 %v1026_v23, %v1025_v22 }
 0x417   :  { %v1030_v26 = vmul.f32 %v2062_v24, %v1027_v25  ;;  %2360 = vmatmul.mubr.msk.f32.vlgmr.msra.gmra.mrb[12].mxu0 %vm50_vm2, %v1027_v25  ;;  %2371 = vmatmul.mubr.msk.f32.vlgmr.msra.gmra.mrb[12].mxu1 %vm50_vm2, %v1027_v25 }
 0x418   :  { %2569 = vmatpush3.bf16.msra.mxu0 %v2839_v16  ;;  %2381 = vmatprep.mubr.msk.f32.mxu0 %vm2738_vm0, %v2739_v6 }
 0x419   :  { %1032 = vst.msk [vmem:[#allocation3 + $0x6] sm:$0x3] %vm34_vm1, %v1030_v26  ;;  %2570 = vmatprep.subr.bf16.mxu0 %v2737_v3  ;;  %2575 = vmatpush3.bf16.msra.mxu1 %v2798_v4 }
 0x41a   :  { %2576 = vmatprep.subr.bf16.mxu1 %v2737_v3  ;;  %2392 = vmatprep.mubr.msk.f32.mxu1 %vm2738_vm0, %v2739_v6 }
 0x41c   :  { %2572 = vmatpush3.bf16.msra.mxu0 %v2853_v20 }
 0x41d   :  { %2579 = vmatprep.subr.bf16.mxu0 %v2737_v3  ;;  %2578 = vmatpush3.bf16.msra.mxu1 %v2825_v12 }
 0x41e   :  { %2585 = vmatprep.subr.bf16.mxu1 %v2737_v3 }
 0x41f   :  { %2382 = vmatmul.mubr.msk.f32.vlgmr.msra.gmra.mrb[14].mxu0 %vm50_vm2, %v1027_v25 }
 0x420   :  { %2581 = vmatpush3.bf16.msra.mxu0 %v2814_v9  ;;  %2403 = vmatprep.mubr.msk.f32.mxu0 %vm2738_vm0, %v2739_v6 }
 0x421   :  { %2582 = vmatprep.subr.bf16.mxu0 %v2737_v3 }
 0x424   :  { %2584 = vmatpush3.bf16.msra.mxu0 %v2829_v13 }
 0x425   :  { %2591 = vmatprep.subr.bf16.mxu0 %v2737_v3 }
 0x4ea   :  { %v1102_v28 = vpop.f32.mrb[12].mxu0  ;;  %v1172_v29 = vpop.f32.mrb[12].mxu1 }
 0x4eb   :  { %v1248_v30 = vadd.f32 %v2066_v27, %v1102_v28  ;;  %v2361_v32 = vpop.f32.mrb[13].mxu0  ;;  %v2372_v33 = vpop.f32.mrb[13].mxu1  ;;  %v1257_v35 = vadd.f32 %v2068_v31, %v1172_v29  ;;  %v2080_v27 = vld [vmem:[%s3136_s0 + $0xa] sm:$0x3] }
 0x4ec   :  { %v2086_v32 = vld [vmem:[%s3138_s2 + $0xc] sm:$0x3] }
 0x4ed   :  { %v2067_v34 = vmul.f32 -1.442695, %v1248_v30  ;;  %v2069_v37 = vmul.f32 -1.442695, %v1257_v35 }
 0x4ef   :  { %2673 = vpow2.f32 %v2067_v34 }
 0x4f0   :  { %2675 = vpow2.f32 %v2069_v37 }
 0x4f2   :  { %v1242_v38 = vpop.f32.mrb[14].mxu0 }
 0x4f3   :  { %v2383_v39 = vpop.f32.mrb[15].mxu0  ;;  %v1243_v44 = vadd.f32 %v2882_v36, %v1242_v38 }
 0x4f9   :  { %v2674_v40 = vpop.eup %2673 }
 0x4fa   :  { %v1252_v41 = vadd.f32 1.0, %v2674_v40  ;;  %v2676_v42 = vpop.eup %2675 }
 0x4fb   :  { %v1261_v43 = vadd.f32 1.0, %v2676_v42 }
 0x4fc   :  { %2677 = vrcp.f32 %v1252_v41 }
 0x4fd   :  { %2679 = vrcp.f32 %v1261_v43 }
 0x506   :  { %v2678_v45 = vpop.eup %2677 }
 0x507   :  { %v1266_v47 = vmul.f32 %v2678_v45, %v1243_v44  ;;  %v2680_v49 = vpop.eup %2679  ;;  %v2088_v45 = vld [vmem:[%s3139_s3 + $0xc] sm:$0x3] }
 0x508   :  { %v1269_v50 = vsub.f32 1.0, %v2680_v49  ;;  %v1271_v53 = vmul.f32 %v2680_v49, %v1027_v25 }
 0x509   :  { %v1267_v48 = vadd.f32 %v2070_v46, %v1266_v47 }
 0x50b   :  { %2681 = vtanh.f32 %v1267_v48 }
 0x515   :  { %v2682_v51 = vpop.eup %2681 }
 0x516   :  { %v1270_v52 = vmul.f32 %v2682_v51, %v1269_v50 }
 0x518   :  { %v1272_v55 = vadd.f32 %v1271_v53, %v1270_v52  ;;  %v2089_v53 = vld [vmem:[%s3136_s0 + $0xc] sm:$0x3] }
 0x51a   :  { %v1275_v56 = vmul.f32 %v2071_v54, %v1272_v55  ;;  %2393 = vmatmul.mubr.msk.f32.vlgmr.msra.gmra.mrb[14].mxu1 %vm50_vm2, %v1272_v55  ;;  %2404 = vmatmul.mubr.msk.f32.vlgmr.msra.gmra.mrb[16].mxu0 %vm50_vm2, %v1272_v55 }
 0x51b   :  { %2587 = vmatpush3.bf16.msra.mxu1 %v2839_v16  ;;  %2414 = vmatprep.mubr.msk.f32.mxu1 %vm2738_vm0, %v2739_v6 }
 0x51c   :  { %1277 = vst.msk [vmem:[#allocation3 + $0x8] sm:$0x3] %vm34_vm1, %v1275_v56  ;;  %2588 = vmatprep.subr.bf16.mxu1 %v2737_v3  ;;  %2593 = vmatpush3.bf16.msra.mxu0 %v2798_v4  ;;  %v2093_v56 = vld [vmem:[%s3137_s1 + $0xe] sm:$0x3] }
 0x51d   :  { %2594 = vmatprep.subr.bf16.mxu0 %v2737_v3  ;;  %2425 = vmatprep.mubr.msk.f32.mxu0 %vm2738_vm0, %v2739_v6 }
 0x51f   :  { %2590 = vmatpush3.bf16.msra.mxu1 %v2853_v20 }
 0x520   :  { %2597 = vmatprep.subr.bf16.mxu1 %v2737_v3  ;;  %2596 = vmatpush3.bf16.msra.mxu0 %v2825_v12 }
 0x521   :  { %2603 = vmatprep.subr.bf16.mxu0 %v2737_v3 }
 0x522   :  { %2415 = vmatmul.mubr.msk.f32.vlgmr.msra.gmra.mrb[16].mxu1 %vm50_vm2, %v1272_v55 }
 0x523   :  { %2599 = vmatpush3.bf16.msra.mxu1 %v2814_v9  ;;  %2436 = vmatprep.mubr.msk.f32.mxu1 %vm2738_vm0, %v2739_v6 }
 0x524   :  { %2600 = vmatprep.subr.bf16.mxu1 %v2737_v3 }
 0x527   :  { %2602 = vmatpush3.bf16.msra.mxu1 %v2829_v13 }
 0x528   :  { %2609 = vmatprep.subr.bf16.mxu1 %v2737_v3 }
 0x5ed   :  { %v1347_v58 = vpop.f32.mrb[14].mxu1  ;;  %v1417_v59 = vpop.f32.mrb[16].mxu0 }
 0x5ee   :  { %v1493_v60 = vadd.f32 %v2075_v57, %v1347_v58  ;;  %v2394_v62 = vpop.f32.mrb[15].mxu1  ;;  %v2405_v63 = vpop.f32.mrb[17].mxu0  ;;  %v1502_v1 = vadd.f32 %v2077_v61, %v1417_v59 }
 0x5f0   :  { %v2076_v0 = vmul.f32 -1.442695, %v1493_v60  ;;  %v2078_v2 = vmul.f32 -1.442695, %v1502_v1 }
 0x5f2   :  { %2683 = vpow2.f32 %v2076_v0 }
 0x5f3   :  { %2685 = vpow2.f32 %v2078_v2 }
 0x5f5   :  { %v1487_v5 = vpop.f32.mrb[16].mxu1 }
 0x5f6   :  { %v2416_v7 = vpop.f32.mrb[17].mxu1  ;;  %v1488_v15 = vadd.f32 %v2882_v36, %v1487_v5 }
 0x5fc   :  { %v2684_v8 = vpop.eup %2683 }
 0x5fd   :  { %v1497_v10 = vadd.f32 1.0, %v2684_v8  ;;  %v2686_v11 = vpop.eup %2685 }
 0x5fe   :  { %v1506_v14 = vadd.f32 1.0, %v2686_v11 }
 0x5ff   :  { %2687 = vrcp.f32 %v1497_v10  ;;  %v2097_v10 = vld [vmem:[%s3139_s3 + $0xe] sm:$0x3]  ;;  %s2713_s3 = scalar_lea.vmem %s2020_s16, 256 }
 0x600   :  { %2689 = vrcp.f32 %v1506_v14  ;;  %p2714_p0 = scmp.ne.s32.totalorder %s2020_s16, %s2713_s3  ;;  %p2719_p2 = scmp.lt.s32.totalorder %s2713_s3, %s2713_s3 }
 0x602   :  { %p2720_p3 = por %p2719_p2, %p2718_p1 }
 0x604   :  { %p2721_p4 = pnand %p2720_p3, %p2714_p0 }
 0x609   :  { %v2688_v17 = vpop.eup %2687 }
 0x60a   :  { %v1511_v19 = vmul.f32 %v2688_v17, %v1488_v15  ;;  %v2690_v22 = vpop.eup %2689 }
 0x60b   :  { %v1514_v23 = vsub.f32 1.0, %v2690_v22  ;;  %v1516_v26 = vmul.f32 %v2690_v22, %v1272_v55  ;;  %v2098_v22 = vld [vmem:[%s3136_s0 + $0xe] sm:$0x3] }
 0x60c   :  { %v1512_v21 = vadd.f32 %v2079_v18, %v1511_v19 }
 0x60e   :  { %2691 = vtanh.f32 %v1512_v21 }
 0x618   :  { %v2692_v24 = vpop.eup %2691 }
 0x619   :  { %v1515_v25 = vmul.f32 %v2692_v24, %v1514_v23 }
 0x61b   :  { %v1517_v28 = vadd.f32 %v1516_v26, %v1515_v25 }
 0x61d   :  { %v1520_v29 = vmul.f32 %v2080_v27, %v1517_v28  ;;  %2426 = vmatmul.mubr.msk.f32.vlgmr.msra.gmra.mrb[18].mxu0 %vm50_vm2, %v1517_v28  ;;  %2437 = vmatmul.mubr.msk.f32.vlgmr.msra.gmra.mrb[18].mxu1 %vm50_vm2, %v1517_v28 }
 0x61e   :  { %2605 = vmatpush3.bf16.msra.mxu0 %v2839_v16  ;;  %2447 = vmatprep.mubr.msk.f32.mxu0 %vm2738_vm0, %v2739_v6 }
 0x61f   :  { %1522 = vst.msk [vmem:[#allocation3 + $0xa] sm:$0x3] %vm34_vm1, %v1520_v29  ;;  %2606 = vmatprep.subr.bf16.mxu0 %v2737_v3  ;;  %2611 = vmatpush3.bf16.msra.mxu1 %v2798_v4  ;;  %v2084_v4 = vld [vmem:[%s3137_s1 + $0xc] sm:$0x3] }
 0x620   :  { %2612 = vmatprep.subr.bf16.mxu1 %v2737_v3  ;;  %2458 = vmatprep.mubr.msk.f32.mxu1 %vm2738_vm0, %v2739_v6 }
 0x622   :  { %2608 = vmatpush3.bf16.msra.mxu0 %v2853_v20 }
 0x623   :  { %2615 = vmatprep.subr.bf16.mxu0 %v2737_v3  ;;  %2614 = vmatpush3.bf16.msra.mxu1 %v2825_v12 }
 0x624   :  { %2621 = vmatprep.subr.bf16.mxu1 %v2737_v3 }
 0x625   :  { %2448 = vmatmul.mubr.msk.f32.vlgmr.msra.gmra.mrb[20].mxu0 %vm50_vm2, %v1517_v28 }
 0x626   :  { %2617 = vmatpush3.bf16.msra.mxu0 %v2814_v9  ;;  %2469 = vmatprep.mubr.msk.f32.mxu0 %vm2738_vm0, %v2739_v6 }
 0x627   :  { %2618 = vmatprep.subr.bf16.mxu0 %v2737_v3 }
 0x62a   :  { %2620 = vmatpush3.bf16.msra.mxu0 %v2829_v13 }
 0x6f0   :  { %v1592_v30 = vpop.f32.mrb[18].mxu0  ;;  %v1662_v31 = vpop.f32.mrb[18].mxu1 }
 0x6f1   :  { %v1738_v12 = vadd.f32 %v2084_v4, %v1592_v30  ;;  %v2427_v33 = vpop.f32.mrb[19].mxu0  ;;  %v2438_v9 = vpop.f32.mrb[19].mxu1  ;;  %v1747_v35 = vadd.f32 %v2086_v32, %v1662_v31 }
 0x6f3   :  { %v2085_v34 = vmul.f32 -1.442695, %v1738_v12  ;;  %v2087_v37 = vmul.f32 -1.442695, %v1747_v35 }
 0x6f5   :  { %2693 = vpow2.f32 %v2085_v34 }
 0x6f6   :  { %2695 = vpow2.f32 %v2087_v37 }
 0x6f8   :  { %v1732_v38 = vpop.f32.mrb[20].mxu0 }
 0x6f9   :  { %v2449_v39 = vpop.f32.mrb[21].mxu0  ;;  %v1733_v43 = vadd.f32 %v2882_v36, %v1732_v38 }
 0x6ff   :  { %v2694_v13 = vpop.eup %2693 }
 0x700   :  { %v1742_v40 = vadd.f32 1.0, %v2694_v13  ;;  %v2696_v41 = vpop.eup %2695 }
 0x701   :  { %v1751_v42 = vadd.f32 1.0, %v2696_v41 }
 0x702   :  { %2697 = vrcp.f32 %v1742_v40 }
 0x703   :  { %2699 = vrcp.f32 %v1751_v42 }
 0x70c   :  { %v2698_v44 = vpop.eup %2697 }
 0x70d   :  { %v1756_v46 = vmul.f32 %v2698_v44, %v1733_v43  ;;  %v2700_v48 = vpop.eup %2699 }
 0x70e   :  { %v1759_v49 = vsub.f32 1.0, %v2700_v48  ;;  %v1761_v52 = vmul.f32 %v2700_v48, %v1517_v28 }
 0x70f   :  { %v1757_v47 = vadd.f32 %v2088_v45, %v1756_v46 }
 0x711   :  { %2701 = vtanh.f32 %v1757_v47 }
 0x71b   :  { %v2702_v50 = vpop.eup %2701 }
 0x71c   :  { %v1760_v51 = vmul.f32 %v2702_v50, %v1759_v49 }
 0x71e   :  { %v1762_v54 = vadd.f32 %v1761_v52, %v1760_v51 }
 0x720   :  { %v1765_v55 = vmul.f32 %v2089_v53, %v1762_v54  ;;  %2459 = vmatmul.mubr.msk.f32.vlgmr.msra.gmra.mrb[20].mxu1 %vm50_vm2, %v1762_v54  ;;  %2470 = vmatmul.mubr.msk.f32.vlgmr.msra.gmra.mrb[22].mxu0 %vm50_vm2, %v1762_v54 }
 0x721   :  { %2623 = vmatpush3.bf16.msra.mxu1 %v2839_v16  ;;  %2480 = vmatprep.mubr.msk.f32.mxu1 %vm2738_vm0, %v2739_v6  ;;  %v2095_v16 = vld [vmem:[%s3138_s2 + $0xe] sm:$0x3] }
 0x722   :  { %1767 = vst.msk [vmem:[#allocation3 + $0xc] sm:$0x3] %vm34_vm1, %v1765_v55  ;;  %2624 = vmatprep.subr.bf16.mxu1 %v2737_v3 }
 0x725   :  { %2626 = vmatpush3.bf16.msra.mxu1 %v2853_v20 }
 0x728   :  { %2481 = vmatmul.mubr.msk.f32.vlgmr.msra.gmra.mrb[22].mxu1 %vm50_vm2, %v1762_v54 }
 0x7f3   :  { %v1837_v57 = vpop.f32.mrb[20].mxu1  ;;  %v1907_v58 = vpop.f32.mrb[22].mxu0 }
 0x7f4   :  { %v1983_v59 = vadd.f32 %v2093_v56, %v1837_v57  ;;  %v2460_v6 = vpop.f32.mrb[21].mxu1  ;;  %v2471_v60 = vpop.f32.mrb[23].mxu0  ;;  %v1992_v62 = vadd.f32 %v2095_v16, %v1907_v58 }
 0x7f6   :  { %v2094_v61 = vmul.f32 -1.442695, %v1983_v59  ;;  %v2096_v3 = vmul.f32 -1.442695, %v1992_v62 }
 0x7f8   :  { %2703 = vpow2.f32 %v2094_v61 }
 0x7f9   :  { %2705 = vpow2.f32 %v2096_v3 }
 0x7fb   :  { %v1977_v20 = vpop.f32.mrb[22].mxu1 }
 0x7fc   :  { %v2482_v63 = vpop.f32.mrb[23].mxu1  ;;  %v1978_v7 = vadd.f32 %v2882_v36, %v1977_v20 }
 0x802   :  { %v2704_v0 = vpop.eup %2703 }
 0x803   :  { %v1987_v1 = vadd.f32 1.0, %v2704_v0  ;;  %v2706_v2 = vpop.eup %2705 }
 0x804   :  { %v1996_v5 = vadd.f32 1.0, %v2706_v2 }
 0x805   :  { %2707 = vrcp.f32 %v1987_v1 }
 0x806   :  { %2709 = vrcp.f32 %v1996_v5 }
 0x80f   :  { %v2708_v8 = vpop.eup %2707 }
 0x810   :  { %v2001_v11 = vmul.f32 %v2708_v8, %v1978_v7  ;;  %v2710_v15 = vpop.eup %2709 }
 0x811   :  { %v2004_v17 = vsub.f32 1.0, %v2710_v15  ;;  %v2006_v19 = vmul.f32 %v2710_v15, %v1762_v54 }
 0x812   :  { %v2002_v14 = vadd.f32 %v2097_v10, %v2001_v11 }
 0x814   :  { %2711 = vtanh.f32 %v2002_v14 }
 0x81e   :  { %v2712_v18 = vpop.eup %2711 }
 0x81f   :  { %v2005_v21 = vmul.f32 %v2712_v18, %v2004_v17 }
 0x821   :  { %v2007_v36 = vadd.f32 %v2006_v19, %v2005_v21 }
 0x823   :  { %v2010_v23 = vmul.f32 %v2098_v22, %v2007_v36  ;;  %2013 = vst.msk [vmem:[#allocation2] sm:$0x3] %vm34_vm1, %v2007_v36 }
 0x825   :  { %2012 = vst.msk [vmem:[#allocation3 + $0xe] sm:$0x3] %vm34_vm1, %v2010_v23 }
 0x826   :  { %2724 = shalt.err (!%p2721_p4)
}
 0x827   :  { %s2725_s0 = scalar_lea.hbm %s3144_s8, 256 }
 0x828   :  { %p2726_p5 = scmp.ne.s32.totalorder %s3144_s8, %s2725_s0  ;;  %p2729_p6 = scmp.lt.u32.totalorder %s2725_s0, %s3144_s8 }
 0x82a   :  { %p2731_p7 = pnand %p2729_p6, %p2726_p5 }
 0x82c   :  { %2734 = shalt.err (!%p2731_p7)
}
 0x82d   :  { %s2741_s22 = smov 32   ;;  %s2742_s23 = smov 2  }
 0x82e   :  { %2025 = dma.vmem_to_hbm [thread:$0]  %s2020_s16, 256, %s3144_s8, [#allocation4], %s2741_s22, %s2741_s22, %s2742_s23  }
 0x82f   :  { %2735 = dma.done.wait [#allocation4], 256  }
 0x830   :  { %2736 = vsyncadd [#allocation4], 4294967040 }
 0x831   :  { %2029 = vsyncpa [#allocation4], 1 }

</bundles_post_ra>
